<compile_context>
chip_gen: v7x
topology: tpu7x:2x2x1
jax: 0.10.0
libtpu: 0.0.40
codegen_flags: <defaults>
</compile_context>

<pallas_src>
import functools

import jax
import jax.numpy as jnp
from jax.experimental import pallas as pl
from jax.experimental.pallas import tpu as pltpu

HIDDEN = 1024
LANE = 128


# ----------------------------------------------------------------------------
# Kernel
# ----------------------------------------------------------------------------
def _simple_head_kernel(x_ref, w1_ref, b1_ref, w2_ref, b2_ref, o_ref, acc_ref,
                        *, n_chunks):
    s = pl.program_id(1)                                # spatial-reduction step

    @pl.when(s == 0)
    def _():
        acc_ref[...] = jnp.zeros_like(acc_ref)

    # Lane-partial pool: VPU adds over static 128-lane chunks of the
    # (tb, C, thw) tile into a (tb, C, 128) f32 accumulator.  Chunks are
    # widened to f32 one at a time, so no full f32 copy of the tile exists.
    partial = acc_ref[...]
    for j in range(n_chunks):                           # static trip count
        partial = partial + x_ref[:, :, j * LANE:(j + 1) * LANE].astype(jnp.float32)
    acc_ref[...] = partial

    @pl.when(s == pl.num_programs(1) - 1)
    def _():
        # Single cross-lane (XLU) reduce, only at finalize.  1/HW is already
        # folded into w1, so this is a plain sum.
        pooled = jnp.sum(acc_ref[...], axis=-1)         # (tb, C) f32
        # MXU matmuls in the weights' stored dtype (bf16-native path when the
        # params are bf16); f32 accumulation via preferred_element_type.
        h = jnp.dot(pooled.astype(w1_ref.dtype), w1_ref[...],
                    preferred_element_type=jnp.float32)
        h = jnp.maximum(h + b1_ref[...], 0.0)           # bias + ReLU (f32)
        out = jnp.dot(h.astype(w2_ref.dtype), w2_ref[...],
                      preferred_element_type=jnp.float32)
        o_ref[...] = (out + b2_ref[...]).astype(o_ref.dtype)


# ----------------------------------------------------------------------------
# VMEM-aware tile planning
# ----------------------------------------------------------------------------
def _physical_vmem_bytes():
    try:
        return int(pltpu.get_tpu_info().vmem_capacity_bytes)
    except Exception:
        return 64 << 20          # most constrained generation (v7x per-TC)


def _plan_tiles(B, C, HW, x_itemsize, w1, w2p, n_pad, hidden,
                *, spatial_tile=None, batch_tile=None):
    phys = _physical_vmem_bytes()
    cap = min(int(phys * 3 // 4), 96 << 20)             # total kernel VMEM plan

    # Resident (single-buffered) weights + f32 biases.
    resident = (w1.size * w1.dtype.itemsize + w2p.size * w2p.dtype.itemsize
                + (hidden + n_pad) * 4)

    # ---- batch tile ---------------------------------------------------------
    if batch_tile is not None:
        tb = batch_tile
    elif B <= 8:
        tb = B                                          # block dim == full dim
    else:
        # Multiple of 8, capped at 64, and chosen so there are >= 2 batch
        # blocks (feeds both v7x TensorCores via the "parallel" axis).
        tb = min(64, 8 * max(1, (B // 2) // 8))
        # Keep the lane-partial pool accumulator within ~1/4 of the plan.
        while tb > 8 and tb * C * LANE * 4 > cap // 4:
            tb -= 8
    acc_bytes = tb * C * LANE * 4
    out_bytes = 2 * tb * n_pad * 4                      # double-buffered output

    # ---- spatial tile -------------------------------------------------------
    HW_lane = pl.cdiv(HW, LANE) * LANE
    if spatial_tile is not None:
        assert spatial_tile % LANE == 0, spatial_tile
        thw = min(spatial_tile, HW_lane)
    else:
        budget = max(cap - resident - 2 * acc_bytes - out_bytes - (2 << 20),
                     2 * LANE * tb * C * x_itemsize)
        per_buf = budget // 2                           # x block double-buffered
        thw = max(LANE, (per_buf // (tb * C * x_itemsize)) // LANE * LANE)
        thw = min(thw, HW_lane)
        if HW % LANE == 0:
            # Prefer an exact divisor of HW (avoids an HBM padding copy),
            # unless it wastes more than half the budgeted tile.
            t = thw
            while t > LANE and HW % t != 0:
                t -= LANE
            if t * 2 >= thw:
                thw = t
    HW_pad = pl.cdiv(HW, thw) * thw
    B_pad = pl.cdiv(B, tb) * tb

    x_block_bytes = tb * C * thw * x_itemsize
    vmem_total = 2 * x_block_bytes + resident + 2 * acc_bytes + out_bytes
    vmem_limit = min(int(phys * 0.9), max(32 << 20, vmem_total + (8 << 20)))
    return tb, thw, HW_pad, B_pad, int(vmem_limit)


# ----------------------------------------------------------------------------
# pallas_call wrapper
# ----------------------------------------------------------------------------
def _run_pallas(x_k, w1, b1, w2p, b2p, *, grid, tb, thw, n_pad, B_pad,
                vmem_limit, cost, single_buffer_weights):
    C = x_k.shape[1]
    hidden = w1.shape[1]
    n_chunks = thw // LANE

    def const_spec(shape):
        if single_buffer_weights:
            return pl.BlockSpec(shape, lambda b, s: (0, 0),
                                pipeline_mode=pl.Buffered(1))
        return pl.BlockSpec(shape, lambda b, s: (0, 0))

    kernel = functools.partial(_simple_head_kernel, n_chunks=n_chunks)
    return pl.pallas_call(
        kernel,
        out_shape=jax.ShapeDtypeStruct((B_pad, n_pad), jnp.float32),
        grid_spec=pltpu.PrefetchScalarGridSpec(
            num_scalar_prefetch=0,
            grid=grid,
            in_specs=[
                pl.BlockSpec((tb, C, thw), lambda b, s: (b, 0, s)),  # x tile
                const_spec((C, hidden)),                             # w1
                const_spec((1, hidden)),                             # b1 (f32)
                const_spec((hidden, n_pad)),                         # w2 (padded)
                const_spec((1, n_pad)),                              # b2 (padded)
            ],
            out_specs=pl.BlockSpec((tb, n_pad), lambda b, s: (b, 0)),
            scratch_shapes=[pltpu.VMEM((tb, C, LANE), jnp.float32)],  # pool acc
        ),
        compiler_params=pltpu.CompilerParams(
            dimension_semantics=("parallel", "arbitrary"),
            vmem_limit_bytes=vmem_limit),
        cost_estimate=cost,
    )(x_k, w1, b1, w2p, b2p)


def prepare_params(params, hw, *, weight_dtype=None):
    """Fold 1/HW into w1, zero-pad fc2 to a lane-dense width, keep biases f32.
    Call once per feature-map geometry and reuse across calls."""
    w1, b1, w2, b2 = params
    out_num = w2.shape[1]
    n_pad = max(LANE, pl.cdiv(out_num, LANE) * LANE)
    wdt = weight_dtype if weight_dtype is not None else w1.dtype
    w1s = (w1.astype(jnp.float32) / float(hw)).astype(wdt)
    w2p = jnp.zeros((w2.shape[0], n_pad), wdt).at[:, :out_num].set(w2.astype(wdt))
    b1f = b1.reshape(1, -1).astype(jnp.float32)
    b2p = jnp.zeros((1, n_pad), jnp.float32).at[:, :out_num].set(
        b2.reshape(1, -1).astype(jnp.float32))
    return (w1s, b1f, w2p, b2p), out_num


def simple_head_forward(feats, prepared, *, spatial_tile=None, batch_tile=None):
    """feats: list/tuple of NCHW feature maps (only the last is used, like the
    PyTorch module).  prepared: output of prepare_params(params, H*W)."""
    x = feats[-1]                                       # (B, C, H, W)
    B, C, H, W = x.shape
    HW = H * W
    (w1, b1, w2p, b2p), out_num = prepared
    hidden = w1.shape[1]
    n_pad = w2p.shape[1]

    tb, thw, HW_pad, B_pad, vmem_limit = _plan_tiles(
        B, C, HW, x.dtype.itemsize, w1, w2p, n_pad, hidden,
        spatial_tile=spatial_tile, batch_tile=batch_tile)

    # Free contiguous reshape (no transpose); zero-pad only if the geometry
    # demands it.  Padding is numerically free: 1/HW is folded into w1 and
    # padded batch rows are sliced away below.
    x_k = x.reshape(B, C, HW)
    if HW_pad != HW or B_pad != B:
        x_k = jnp.pad(x_k, ((0, B_pad - B), (0, 0), (0, HW_pad - HW)))

    grid = (B_pad // tb, HW_pad // thw)

    flops = int(2 * B_pad * C * HW_pad + 2 * B_pad * C * hidden
                + 2 * B_pad * hidden * n_pad)
    bytes_accessed = int(
        x_k.size * x_k.dtype.itemsize
        + w1.size * w1.dtype.itemsize + b1.size * b1.dtype.itemsize
        + w2p.size * w2p.dtype.itemsize + b2p.size * b2p.dtype.itemsize
        + B_pad * n_pad * 4)
    cost = pl.CostEstimate(flops=flops, transcendentals=0,
                           bytes_accessed=bytes_accessed)

    run = functools.partial(
        _run_pallas, x_k, w1, b1, w2p, b2p, grid=grid, tb=tb, thw=thw,
        n_pad=n_pad, B_pad=B_pad, vmem_limit=vmem_limit, cost=cost)
    try:
        out_padded = run(single_buffer_weights=True)
    except Exception:
        # TODO(synk): pipeline_mode=pl.Buffered(1) rejected on this jax build;
        # fall back to default double-buffered resident weights.
        out_padded = run(single_buffer_weights=False)

    # Slice padded batch rows / lane-padded output back to the module's shape.
    return out_padded[:B, :out_num]


# ----------------------------------------------------------------------------
# Reference / init / self-test
# ----------------------------------------------------------------------------
def init_params(key, feats_dim, out_num=1, hidden=HIDDEN):
    """Deterministic synthetic init matching nn.Linear shapes (kept (in, out))."""
    k1, k2, k3, k4 = jax.random.split(key, 4)
    bound1 = 1.0 / jnp.sqrt(feats_dim)
    bound2 = 1.0 / jnp.sqrt(hidden)
    w1 = jax.random.uniform(k1, (feats_dim, hidden), jnp.float32, -bound1, bound1)
    b1 = jax.random.uniform(k2, (1, hidden), jnp.float32, -bound1, bound1)
    w2 = jax.random.uniform(k3, (hidden, out_num), jnp.float32, -bound2, bound2)
    b2 = jax.random.uniform(k4, (1, out_num), jnp.float32, -bound2, bound2)
    return w1, b1, w2, b2


def simple_head_reference(feats, params):
    """Pure-JAX reference mirroring the PyTorch forward."""
    x = feats[-1]
    pooled = jnp.mean(x.astype(jnp.float32), axis=(2, 3))            # (B, C)
    w1, b1, w2, b2 = params
    h = jnp.maximum(pooled @ w1 + b1, 0.0)
    return h @ w2 + b2


if __name__ == "__main__":
    key = jax.random.PRNGKey(0)
    kx, kp = jax.random.split(key)

    # SimpleHead(feats_dims=[..., 32]) -> feats_dims[-1] = 32
    B, C, H, W = 2, 32, 16, 16
    out_num = 1

    x_last = jax.random.normal(kx, (B, C, H, W), jnp.float32)
    feats = [x_last]                       # module takes a list, uses the last map

    params = init_params(kp, feats_dim=C, out_num=out_num)
    ref = simple_head_reference(feats, params)

    # f32 path, default tiling (single spatial block at this size).
    prepared = prepare_params(params, hw=H * W)
    out = jax.block_until_ready(simple_head_forward(feats, prepared))
    assert out.shape == (B, out_num), out.shape
    assert jnp.allclose(out, ref, atol=1e-4, rtol=1e-4), (out, ref)

    # Forced 2-step spatial reduction exercises the pl.when accumulator path.
    out2 = jax.block_until_ready(
        simple_head_forward(feats, prepared, spatial_tile=128))
    assert jnp.allclose(out2, ref, atol=1e-4, rtol=1e-4), (out2, ref)

    # bf16 feature map + bf16 weights (halves the dominant HBM read); the pool
    # accumulator and both matmul accumulations stay f32.
    feats_bf16 = [x_last.astype(jnp.bfloat16)]
    prepared_bf16, _ = None, None
    prepared_bf16 = prepare_params(params, hw=H * W, weight_dtype=jnp.bfloat16)
    out3 = jax.block_until_ready(simple_head_forward(feats_bf16, prepared_bf16))
    assert out3.shape == (B, out_num), out3.shape
    assert jnp.allclose(out3, ref, atol=1e-1, rtol=1e-1), (out3, ref)

    print("KERNEL_OK")
</pallas_src>

<mosaic_0001>
module attributes {stable_mosaic.version = 11 : i64} {
  func.func @_simple_head_kernel(%arg0: i32, %arg1: i32, %arg2: memref<2x32x256xf32, #tpu.memory_space<vmem>>, %arg3: memref<32x1024xf32, #tpu.memory_space<vmem>>, %arg4: memref<1x1024xf32, #tpu.memory_space<vmem>>, %arg5: memref<1024x128xf32, #tpu.memory_space<vmem>>, %arg6: memref<1x128xf32, #tpu.memory_space<vmem>>, %arg7: memref<2x128xf32, #tpu.memory_space<vmem>>, %arg8: memref<2x32x128xf32, #tpu.memory_space<vmem>>) attributes {dimension_semantics = [#tpu.dimension_semantics<parallel>, #tpu.dimension_semantics<arbitrary>], iteration_bounds = array<i64: 1, 1>, scalar_prefetch = 0 : i64, scratch_operands = 1 : i64, tpu.core_type = #tpu.core_type<tc>, window_params = [{transform_indices = @transform_0, window_bounds = array<i64: 2, 32, 256>}, {pipeline_mode = #tpu.pipeline_mode<synchronous>, transform_indices = @transform_1, window_bounds = array<i64: 32, 1024>}, {pipeline_mode = #tpu.pipeline_mode<synchronous>, transform_indices = @transform_2, window_bounds = array<i64: 1, 1024>}, {pipeline_mode = #tpu.pipeline_mode<synchronous>, transform_indices = @transform_3, window_bounds = array<i64: 1024, 128>}, {pipeline_mode = #tpu.pipeline_mode<synchronous>, transform_indices = @transform_4, window_bounds = array<i64: 1, 128>}, {transform_indices = @transform_5, window_bounds = array<i64: 2, 128>}]} {
    %c0_i32 = arith.constant 0 : i32
    %0 = arith.cmpi eq, %arg1, %c0_i32 : i32
    %1 = arith.extui %0 : i1 to i32
    %c0_i32_0 = arith.constant 0 : i32
    %2 = arith.cmpi ne, %1, %c0_i32_0 : i32
    scf.if %2 {
      %cst = arith.constant 0.000000e+00 : f32
      %12 = vector.broadcast %cst : f32 to vector<2x32x128xf32>
      %c0_13 = arith.constant 0 : index
      %c0_14 = arith.constant 0 : index
      %c0_15 = arith.constant 0 : index
      %13 = vector.load %arg8[%c0_13, %c0_14, %c0_15] : memref<2x32x128xf32, #tpu.memory_space<vmem>>, vector<2x32x128xf32>
      tpu.vector_store %arg8[%c0_13, %c0_14, %c0_15], %12 {strides = array<i32>} : memref<2x32x128xf32, #tpu.memory_space<vmem>>, vector<2x32x128xf32>,
    } else {
    }
    %c0 = arith.constant 0 : index
    %c0_1 = arith.constant 0 : index
    %c0_2 = arith.constant 0 : index
    %3 = vector.load %arg8[%c0, %c0_1, %c0_2] : memref<2x32x128xf32, #tpu.memory_space<vmem>>, vector<2x32x128xf32>
    %c0_3 = arith.constant 0 : index
    %c0_4 = arith.constant 0 : index
    %c0_5 = arith.constant 0 : index
    %4 = vector.load %arg2[%c0_3, %c0_4, %c0_5] : memref<2x32x256xf32, #tpu.memory_space<vmem>>, vector<2x32x128xf32>
    %5 = arith.addf %3, %4 : vector<2x32x128xf32>
    %c0_6 = arith.constant 0 : index
    %c0_7 = arith.constant 0 : index
    %c128 = arith.constant 128 : index
    %6 = vector.load %arg2[%c0_6, %c0_7, %c128] : memref<2x32x256xf32, #tpu.memory_space<vmem>>, vector<2x32x128xf32>
    %7 = arith.addf %5, %6 : vector<2x32x128xf32>
    %c0_8 = arith.constant 0 : index
    %c0_9 = arith.constant 0 : index
    %c0_10 = arith.constant 0 : index
    %8 = vector.load %arg8[%c0_8, %c0_9, %c0_10] : memref<2x32x128xf32, #tpu.memory_space<vmem>>, vector<2x32x128xf32>
    tpu.vector_store %arg8[%c0_8, %c0_9, %c0_10], %7 {strides = array<i32>} : memref<2x32x128xf32, #tpu.memory_space<vmem>>, vector<2x32x128xf32>,
    %c0_i32_11 = arith.constant 0 : i32
    %9 = arith.cmpi eq, %arg1, %c0_i32_11 : i32
    %10 = arith.extui %9 : i1 to i32
    %c0_i32_12 = arith.constant 0 : i32
    %11 = arith.cmpi ne, %10, %c0_i32_12 : i32
    scf.if %11 {
      %c0_13 = arith.constant 0 : index
      %c0_14 = arith.constant 0 : index
      %c0_15 = arith.constant 0 : index
      %12 = vector.load %arg8[%c0_13, %c0_14, %c0_15] : memref<2x32x128xf32, #tpu.memory_space<vmem>>, vector<2x32x128xf32>
      %cst = arith.constant dense<0.000000e+00> : vector<2x32xf32>
      %13 = vector.multi_reduction <add>, %12, %cst [2] : vector<2x32x128xf32> to vector<2x32xf32>
      %c0_16 = arith.constant 0 : index
      %c0_17 = arith.constant 0 : index
      %14 = vector.load %arg3[%c0_16, %c0_17] : memref<32x1024xf32, #tpu.memory_space<vmem>>, vector<32x1024xf32>
      %cst_18 = arith.constant dense<0.000000e+00> : vector<2x1024xf32>
      %15 = tpu.matmul %13, %14, %cst_18 {dimension_numbers = #tpu.dot_dimension_numbers<[1], [0], [0], [1], [0, 0, 1, 1], [], []>} : vector<2x32xf32>, vector<32x1024xf32>, vector<2x1024xf32> -> vector<2x1024xf32>
      %c0_19 = arith.constant 0 : index
      %c0_20 = arith.constant 0 : index
      %16 = vector.load %arg4[%c0_19, %c0_20] : memref<1x1024xf32, #tpu.memory_space<vmem>>, vector<1x1024xf32>
      %17 = vector.broadcast %16 : vector<1x1024xf32> to vector<2x1024xf32>
      %18 = arith.addf %15, %17 : vector<2x1024xf32>
      %cst_21 = arith.constant 0.000000e+00 : f32
      %19 = vector.broadcast %cst_21 : f32 to vector<2x1024xf32>
      %20 = arith.maximumf %18, %19 : vector<2x1024xf32>
      %c0_22 = arith.constant 0 : index
      %c0_23 = arith.constant 0 : index
      %21 = vector.load %arg5[%c0_22, %c0_23] : memref<1024x128xf32, #tpu.memory_space<vmem>>, vector<1024x128xf32>
      %cst_24 = arith.constant dense<0.000000e+00> : vector<2x128xf32>
      %22 = tpu.matmul %20, %21, %cst_24 {dimension_numbers = #tpu.dot_dimension_numbers<[1], [0], [0], [1], [0, 0, 1, 1], [], []>} : vector<2x1024xf32>, vector<1024x128xf32>, vector<2x128xf32> -> vector<2x128xf32>
      %c0_25 = arith.constant 0 : index
      %c0_26 = arith.constant 0 : index
      %23 = vector.load %arg6[%c0_25, %c0_26] : memref<1x128xf32, #tpu.memory_space<vmem>>, vector<1x128xf32>
      %24 = vector.broadcast %23 : vector<1x128xf32> to vector<2x128xf32>
      %25 = arith.addf %22, %24 : vector<2x128xf32>
      %c0_27 = arith.constant 0 : index
      %c0_28 = arith.constant 0 : index
      %26 = vector.load %arg7[%c0_27, %c0_28] : memref<2x128xf32, #tpu.memory_space<vmem>>, vector<2x128xf32>
      tpu.vector_store %arg7[%c0_27, %c0_28], %25 {strides = array<i32>} : memref<2x128xf32, #tpu.memory_space<vmem>>, vector<2x128xf32>,
    } else {
    }
    return
  }
  func.func @transform_0(%arg0: i32, %arg1: i32) -> (i32, i32, i32) {
    %c0_i32 = arith.constant 0 : i32
    %c0_i32_0 = arith.constant 0 : i32
    return %arg0, %c0_i32, %arg1 : i32, i32, i32
  }
  func.func @transform_1(%arg0: i32, %arg1: i32) -> (i32, i32) {
    %c0_i32 = arith.constant 0 : i32
    %c0_i32_0 = arith.constant 0 : i32
    %c0_i32_1 = arith.constant 0 : i32
    return %c0_i32, %c0_i32_0 : i32, i32
  }
  func.func @transform_2(%arg0: i32, %arg1: i32) -> (i32, i32) {
    %c0_i32 = arith.constant 0 : i32
    %c0_i32_0 = arith.constant 0 : i32
    %c0_i32_1 = arith.constant 0 : i32
    return %c0_i32, %c0_i32_0 : i32, i32
  }
  func.func @transform_3(%arg0: i32, %arg1: i32) -> (i32, i32) {
    %c0_i32 = arith.constant 0 : i32
    %c0_i32_0 = arith.constant 0 : i32
    %c0_i32_1 = arith.constant 0 : i32
    return %c0_i32, %c0_i32_0 : i32, i32
  }
  func.func @transform_4(%arg0: i32, %arg1: i32) -> (i32, i32) {
    %c0_i32 = arith.constant 0 : i32
    %c0_i32_0 = arith.constant 0 : i32
    %c0_i32_1 = arith.constant 0 : i32
    return %c0_i32, %c0_i32_0 : i32, i32
  }
  func.func @transform_5(%arg0: i32, %arg1: i32) -> (i32, i32) {
    %c0_i32 = arith.constant 0 : i32
    %c0_i32_0 = arith.constant 0 : i32
    return %arg0, %c0_i32 : i32, i32
  }
}

module attributes {stable_mosaic.version = 11 : i64} {
  func.func @_simple_head_kernel(%arg0: i32, %arg1: i32, %arg2: memref<2x32x256xf32, #tpu.memory_space<vmem>>, %arg3: memref<32x1024xf32, #tpu.memory_space<vmem>>, %arg4: memref<1x1024xf32, #tpu.memory_space<vmem>>, %arg5: memref<1024x128xf32, #tpu.memory_space<vmem>>, %arg6: memref<1x128xf32, #tpu.memory_space<vmem>>, %arg7: memref<2x128xf32, #tpu.memory_space<vmem>>, %arg8: memref<2x32x128xf32, #tpu.memory_space<vmem>>) attributes {dimension_semantics = [#tpu.dimension_semantics<parallel>, #tpu.dimension_semantics<arbitrary>], iteration_bounds = array<i64: 1, 1>, scalar_prefetch = 0 : i64, scratch_operands = 1 : i64, tpu.core_type = #tpu.core_type<tc>, window_params = [{transform_indices = @transform_0, window_bounds = array<i64: 2, 32, 256>}, {pipeline_mode = #tpu.pipeline_mode<synchronous>, transform_indices = @transform_1, window_bounds = array<i64: 32, 1024>}, {pipeline_mode = #tpu.pipeline_mode<synchronous>, transform_indices = @transform_2, window_bounds = array<i64: 1, 1024>}, {pipeline_mode = #tpu.pipeline_mode<synchronous>, transform_indices = @transform_3, window_bounds = array<i64: 1024, 128>}, {pipeline_mode = #tpu.pipeline_mode<synchronous>, transform_indices = @transform_4, window_bounds = array<i64: 1, 128>}, {transform_indices = @transform_5, window_bounds = array<i64: 2, 128>}]} {
    %c0_i32 = arith.constant 0 : i32
    %0 = arith.cmpi eq, %arg1, %c0_i32 : i32
    %1 = arith.extui %0 : i1 to i32
    %c0_i32_0 = arith.constant 0 : i32
    %2 = arith.cmpi ne, %1, %c0_i32_0 : i32
    scf.if %2 {
      %cst = arith.constant 0.000000e+00 : f32
      %12 = vector.broadcast %cst : f32 to vector<2x32x128xf32>
      %c0_13 = arith.constant 0 : index
      %c0_14 = arith.constant 0 : index
      %c0_15 = arith.constant 0 : index
      %13 = vector.load %arg8[%c0_13, %c0_14, %c0_15] : memref<2x32x128xf32, #tpu.memory_space<vmem>>, vector<2x32x128xf32>
      tpu.vector_store %arg8[%c0_13, %c0_14, %c0_15], %12 {strides = array<i32>} : memref<2x32x128xf32, #tpu.memory_space<vmem>>, vector<2x32x128xf32>,
    } else {
    }
    %c0 = arith.constant 0 : index
    %c0_1 = arith.constant 0 : index
    %c0_2 = arith.constant 0 : index
    %3 = vector.load %arg8[%c0, %c0_1, %c0_2] : memref<2x32x128xf32, #tpu.memory_space<vmem>>, vector<2x32x128xf32>
    %c0_3 = arith.constant 0 : index
    %c0_4 = arith.constant 0 : index
    %c0_5 = arith.constant 0 : index
    %4 = vector.load %arg2[%c0_3, %c0_4, %c0_5] : memref<2x32x256xf32, #tpu.memory_space<vmem>>, vector<2x32x128xf32>
    %5 = arith.addf %3, %4 : vector<2x32x128xf32>
    %c0_6 = arith.constant 0 : index
    %c0_7 = arith.constant 0 : index
    %c128 = arith.constant 128 : index
    %6 = vector.load %arg2[%c0_6, %c0_7, %c128] : memref<2x32x256xf32, #tpu.memory_space<vmem>>, vector<2x32x128xf32>
    %7 = arith.addf %5, %6 : vector<2x32x128xf32>
    %c0_8 = arith.constant 0 : index
    %c0_9 = arith.constant 0 : index
    %c0_10 = arith.constant 0 : index
    %8 = vector.load %arg8[%c0_8, %c0_9, %c0_10] : memref<2x32x128xf32, #tpu.memory_space<vmem>>, vector<2x32x128xf32>
    tpu.vector_store %arg8[%c0_8, %c0_9, %c0_10], %7 {strides = array<i32>} : memref<2x32x128xf32, #tpu.memory_space<vmem>>, vector<2x32x128xf32>,
    %c0_i32_11 = arith.constant 0 : i32
    %9 = arith.cmpi eq, %arg1, %c0_i32_11 : i32
    %10 = arith.extui %9 : i1 to i32
    %c0_i32_12 = arith.constant 0 : i32
    %11 = arith.cmpi ne, %10, %c0_i32_12 : i32
    scf.if %11 {
      %c0_13 = arith.constant 0 : index
      %c0_14 = arith.constant 0 : index
      %c0_15 = arith.constant 0 : index
      %12 = vector.load %arg8[%c0_13, %c0_14, %c0_15] : memref<2x32x128xf32, #tpu.memory_space<vmem>>, vector<2x32x128xf32>
      %cst = arith.constant dense<0.000000e+00> : vector<2x32xf32>
      %13 = vector.multi_reduction <add>, %12, %cst [2] : vector<2x32x128xf32> to vector<2x32xf32>
      %c0_16 = arith.constant 0 : index
      %c0_17 = arith.constant 0 : index
      %14 = vector.load %arg3[%c0_16, %c0_17] : memref<32x1024xf32, #tpu.memory_space<vmem>>, vector<32x1024xf32>
      %cst_18 = arith.constant dense<0.000000e+00> : vector<2x1024xf32>
      %15 = tpu.matmul %13, %14, %cst_18 {dimension_numbers = #tpu.dot_dimension_numbers<[1], [0], [0], [1], [0, 0, 1, 1], [], []>} : vector<2x32xf32>, vector<32x1024xf32>, vector<2x1024xf32> -> vector<2x1024xf32>
      %c0_19 = arith.constant 0 : index
      %c0_20 = arith.constant 0 : index
      %16 = vector.load %arg4[%c0_19, %c0_20] : memref<1x1024xf32, #tpu.memory_space<vmem>>, vector<1x1024xf32>
      %17 = vector.broadcast %16 : vector<1x1024xf32> to vector<2x1024xf32>
      %18 = arith.addf %15, %17 : vector<2x1024xf32>
      %cst_21 = arith.constant 0.000000e+00 : f32
      %19 = vector.broadcast %cst_21 : f32 to vector<2x1024xf32>
      %20 = arith.maximumf %18, %19 : vector<2x1024xf32>
      %c0_22 = arith.constant 0 : index
      %c0_23 = arith.constant 0 : index
      %21 = vector.load %arg5[%c0_22, %c0_23] : memref<1024x128xf32, #tpu.memory_space<vmem>>, vector<1024x128xf32>
      %cst_24 = arith.constant dense<0.000000e+00> : vector<2x128xf32>
      %22 = tpu.matmul %20, %21, %cst_24 {dimension_numbers = #tpu.dot_dimension_numbers<[1], [0], [0], [1], [0, 0, 1, 1], [], []>} : vector<2x1024xf32>, vector<1024x128xf32>, vector<2x128xf32> -> vector<2x128xf32>
      %c0_25 = arith.constant 0 : index
      %c0_26 = arith.constant 0 : index
      %23 = vector.load %arg6[%c0_25, %c0_26] : memref<1x128xf32, #tpu.memory_space<vmem>>, vector<1x128xf32>
      %24 = vector.broadcast %23 : vector<1x128xf32> to vector<2x128xf32>
      %25 = arith.addf %22, %24 : vector<2x128xf32>
      %c0_27 = arith.constant 0 : index
      %c0_28 = arith.constant 0 : index
      %26 = vector.load %arg7[%c0_27, %c0_28] : memref<2x128xf32, #tpu.memory_space<vmem>>, vector<2x128xf32>
      tpu.vector_store %arg7[%c0_27, %c0_28], %25 {strides = array<i32>} : memref<2x128xf32, #tpu.memory_space<vmem>>, vector<2x128xf32>,
    } else {
    }
    return
  }
  func.func @transform_0(%arg0: i32, %arg1: i32) -> (i32, i32, i32) {
    %c0_i32 = arith.constant 0 : i32
    %c0_i32_0 = arith.constant 0 : i32
    return %arg0, %c0_i32, %arg1 : i32, i32, i32
  }
  func.func @transform_1(%arg0: i32, %arg1: i32) -> (i32, i32) {
    %c0_i32 = arith.constant 0 : i32
    %c0_i32_0 = arith.constant 0 : i32
    %c0_i32_1 = arith.constant 0 : i32
    return %c0_i32, %c0_i32_0 : i32, i32
  }
  func.func @transform_2(%arg0: i32, %arg1: i32) -> (i32, i32) {
    %c0_i32 = arith.constant 0 : i32
    %c0_i32_0 = arith.constant 0 : i32
    %c0_i32_1 = arith.constant 0 : i32
    return %c0_i32, %c0_i32_0 : i32, i32
  }
  func.func @transform_3(%arg0: i32, %arg1: i32) -> (i32, i32) {
    %c0_i32 = arith.constant 0 : i32
    %c0_i32_0 = arith.constant 0 : i32
    %c0_i32_1 = arith.constant 0 : i32
    return %c0_i32, %c0_i32_0 : i32, i32
  }
  func.func @transform_4(%arg0: i32, %arg1: i32) -> (i32, i32) {
    %c0_i32 = arith.constant 0 : i32
    %c0_i32_0 = arith.constant 0 : i32
    %c0_i32_1 = arith.constant 0 : i32
    return %c0_i32, %c0_i32_0 : i32, i32
  }
  func.func @transform_5(%arg0: i32, %arg1: i32) -> (i32, i32) {
    %c0_i32 = arith.constant 0 : i32
    %c0_i32_0 = arith.constant 0 : i32
    return %arg0, %c0_i32 : i32, i32
  }
}

</mosaic_0001>

<bundles_post_ra>
// kernel: tpu_custom_call.1
= control target key start
LH: loop header
LB: loop body
LE: loop exit
PB: predicated region body
PF: predicated region fallthrough
CT: control target
= control target key end

     0   :  { %10 = vsyncpa [#allocation4], 0  ;;  %s1611_s0 = inlined_call_operand.hbm [shape: f32[2,32,256], index: 0, kind: input, shape index: {}]   ;;  %s1612_s1 = inlined_call_operand.hbm [shape: f32[32,1024], index: 1, kind: input, shape index: {}]   ;;  %s1613_s2 = inlined_call_operand.hbm [shape: f32[1,1024], index: 2, kind: input, shape index: {}]   ;;  %s1614_s3 = inlined_call_operand.hbm [shape: f32[1024,128], index: 3, kind: input, shape index: {}]   ;;  %s1615_s4 = inlined_call_operand.vmem [shape: f32[1,128], index: 4, kind: input, shape index: {}]   ;;  %s1616_s5 = inlined_call_operand.hbm [shape: f32[2,128], index: 5, kind: output, shape index: {}]  }
   0x1   :  { %11 = vsyncpa [#allocation7], 0 }
   0x2   :  { %12 = vsyncpa [#allocation10], 0 }
   0x3   :  { %13 = vsyncpa [#allocation5], 0  ;;  %s1454_s18 = smov [#allocation6]   ;;  %s1336_s22 = scalar_lea.hbm %s1612_s1, 4096 }
   0x4   :  { %s31_s19 = sshll.u32 %s1454_s18, 4  ;;  %p1337_p0 = scmp.ne.s32.totalorder %s1612_s1, %s1336_s22  ;;  %s32_s19 = int_to_ptr.vmem [resolvable:$true] %s31_s19 }
   0x5   :  { %p1340_p1 = scmp.lt.u32.totalorder %s1336_s22, %s1612_s1 }
   0x7   :  { %p1342_p2 = pnand %p1340_p1, %p1337_p0 }
   0x9   :  { %1345 = shalt.err (!%p1342_p2)
}
   0xa   :  { %s1346_s27 = scalar_lea.vmem %s32_s19, 4096  ;;  %p1351_p4 = scmp.lt.s32.totalorder %s32_s19, %s32_s19 }
   0xb   :  { %p1347_p3 = scmp.ne.s32.totalorder %s32_s19, %s1346_s27  ;;  %p1352_p5 = scmp.lt.s32.totalorder %s1346_s27, %s1346_s27 }
   0xd   :  { %p1353_p6 = por %p1352_p5, %p1351_p4 }
   0xf   :  { %p1354_p7 = pnand %p1353_p6, %p1347_p3 }
  0x11   :  { %1357 = shalt.err (!%p1354_p7)
}
  0x12   :  { %s1455_s28 = smov 1024   ;;  %s1456_s29 = smov 64  }
  0x13   :  { %37 = dma.hbm_to_vmem [thread:$0]  %s1612_s1, 4096, %s32_s19, [#allocation7], %s1455_s28, %s1455_s28, %s1456_s29  }
  0x14   :  { %s1457_s7 = smov [#allocation3]   ;;  %s1358_s11 = scalar_lea.hbm %s1611_s0, 2048 }
  0x15   :  { %s19_s8 = sshll.u32 %s1457_s7, 4  ;;  %p1359_p8 = scmp.ne.s32.totalorder %s1611_s0, %s1358_s11  ;;  %s20_s8 = int_to_ptr.vmem [resolvable:$true] %s19_s8 }
  0x16   :  { %p1362_p9 = scmp.lt.u32.totalorder %s1358_s11, %s1611_s0 }
  0x18   :  { %p1364_p10 = pnand %p1362_p9, %p1359_p8 }
  0x1a   :  { %1367 = shalt.err (!%p1364_p10)
}
  0x1b   :  { %s1368_s16 = scalar_lea.vmem %s20_s8, 2048  ;;  %p1373_p12 = scmp.lt.s32.totalorder %s20_s8, %s20_s8 }
  0x1c   :  { %p1369_p11 = scmp.ne.s32.totalorder %s20_s8, %s1368_s16  ;;  %p1374_p13 = scmp.lt.s32.totalorder %s1368_s16, %s1368_s16 }
  0x1e   :  { %p1375_p0 = por %p1374_p13, %p1373_p12 }
  0x20   :  { %p1376_p1 = pnand %p1375_p0, %p1369_p11 }
  0x22   :  { %1379 = shalt.err (!%p1376_p1)
}
  0x23   :  { %s1458_s1 = smov 256   ;;  %s1459_s17 = smov 16  }
  0x24   :  { %25 = dma.hbm_to_vmem [thread:$0]  %s1611_s0, 2048, %s20_s8, [#allocation4], %s1458_s1, %s1458_s1, %s1459_s17  }
  0x25   :  { %s1460_s20 = smov [#allocation8]   ;;  %s1461_s22 = smov [#allocation9]  }
  0x26   :  { %s44_s21 = sshll.u32 %s1460_s20, 4  ;;  %s53_s23 = sshll.u32 %s1461_s22, 4  ;;  %s45_s21 = int_to_ptr.vmem [resolvable:$true] %s44_s21  ;;  %s1520_s23 = int_to_ptr.vmem [resolvable:$true] %s53_s23 }
  0x27   :  { %s1380_s26 = scalar_lea.hbm %s1613_s2, 128 }
  0x28   :  { %p1381_p2 = scmp.ne.s32.totalorder %s1613_s2, %s1380_s26  ;;  %p1384_p3 = scmp.lt.u32.totalorder %s1380_s26, %s1613_s2 }
  0x2a   :  { %p1386_p4 = pnand %p1384_p3, %p1381_p2 }
  0x2c   :  { %1389 = shalt.err (!%p1386_p4)
}
  0x2d   :  { %s1390_s0 = scalar_lea.vmem %s45_s21, 128  ;;  %p1395_p6 = scmp.lt.s32.totalorder %s45_s21, %s45_s21 }
  0x2e   :  { %p1391_p5 = scmp.ne.s32.totalorder %s45_s21, %s1390_s0  ;;  %p1396_p7 = scmp.lt.s32.totalorder %s1390_s0, %s1390_s0 }
  0x30   :  { %p1397_p8 = por %p1396_p7, %p1395_p6 }
  0x32   :  { %p1398_p9 = pnand %p1397_p8, %p1391_p5 }
  0x34   :  { %1401 = shalt.err (!%p1398_p9)
}
  0x35   :  { %47 = dma.hbm_to_vmem [thread:$0]  %s1613_s2, 128, %s45_s21, [#allocation7]  }
  0x36   :  { %s1402_s10 = scalar_lea.hbm %s1614_s3, 16384 }
  0x37   :  { %p1403_p10 = scmp.ne.s32.totalorder %s1614_s3, %s1402_s10  ;;  %p1406_p11 = scmp.lt.u32.totalorder %s1402_s10, %s1614_s3 }
  0x39   :  { %p1408_p12 = pnand %p1406_p11, %p1403_p10 }
  0x3b   :  { %1411 = shalt.err (!%p1408_p12)
}
  0x3c   :  { %s1412_s15 = scalar_lea.vmem %s1520_s23, 16384  ;;  %p1417_p0 = scmp.lt.s32.totalorder %s1520_s23, %s1520_s23 }
  0x3d   :  { %p1413_p13 = scmp.ne.s32.totalorder %s1520_s23, %s1412_s15  ;;  %p1418_p1 = scmp.lt.s32.totalorder %s1412_s15, %s1412_s15 }
  0x3f   :  { %p1419_p2 = por %p1418_p1, %p1417_p0 }
  0x41   :  { %p1420_p3 = pnand %p1419_p2, %p1413_p13 }
  0x43   :  { %1423 = shalt.err (!%p1420_p3)
}
  0x44   :  { %s1462_s2 = smov 128   ;;  %s1463_s16 = smov 8  }
  0x45   :  { %59 = dma.hbm_to_vmem [thread:$0]  %s1614_s3, 16384, %s1520_s23, [#allocation10], %s1462_s2, %s1462_s2, %s1463_s16  }
  0x46   :  { %1446 = dma.done.wait [#allocation4], 2048  }
  0x47   :  { %1447 = vsyncadd [#allocation4], 4294965248 }
  0x48   :  { %1448 = dma.done.wait [#allocation7], 4224  }
  0x49   :  { %1449 = vsyncadd [#allocation7], 4294963072 }
  0x4a   :  { %1450 = dma.done.wait [#allocation10], 16384  }
  0x4b   :  { %1451 = vsyncadd [#allocation10], 4294950912  ;;  %v98_v0 = vld [vmem:[#allocation3 + $0x40] sm:$0xff]  ;;  %v114_v1 = vld [vmem:[#allocation3 + $0x48] sm:$0xff]  ;;  %v1464_v54 = vmov 0.0   ;;  %v195_v55 = vlaneseq  ;;  %vm254_vm0 = vcmask 130112  }
  0x4c   :  { %v94_v2 = vld [vmem:[#allocation3] sm:$0xff]  ;;  %v122_v3 = vadd.f32 %v114_v1, %v98_v0  ;;  %v110_v4 = vld [vmem:[#allocation3 + $0x8] sm:$0xff]  ;;  %v99_v5 = vld [vmem:[#allocation3 + $0x50] sm:$0xff]  ;;  %358 = vmatprep.mubr.f32.mxu0 %v1464_v54  ;;  %429 = vmatprep.mubr.f32.mxu1 %v1464_v54  ;;  %vm261_vm1 = vcmask 195712   ;;  %vm268_vm2 = vcmask 261312   ;;  %vm289_vm3 = vcmask 1041409  }
  0x4d   :  { %v115_v6 = vld [vmem:[#allocation3 + $0x58] sm:$0xff]  ;;  %v118_v7 = vadd.f32 %v110_v4, %v94_v2  ;;  %v95_v8 = vld [vmem:[#allocation3 + $0x10] sm:$0xff]  ;;  %v100_v12 = vld [vmem:[#allocation3 + $0x60] sm:$0xff]  ;;  %v244_v56 = vand.u32 127, %v195_v55  ;;  %v1553_v61 = vshrl.u32 %v195_v55, 7  ;;  %vm291_vm4 = vcmask 261120  }
  0x4e   :  { %v111_v9 = vld [vmem:[#allocation3 + $0x18] sm:$0xff]  ;;  %153 = vadd.xlane.f32.xlu1 %v122_v3  ;;  %v123_v10 = vadd.f32 %v115_v6, %v99_v5  ;;  %v116_v13 = vld [vmem:[#allocation3 + $0x68] sm:$0xff]  ;;  %v96_v14 = vld [vmem:[#allocation3 + $0x20] sm:$0xff]  ;;  %s1465_s19 = smov [#allocation11]  }
  0x4f   :  { %145 = vadd.xlane.f32.xlu0 %v118_v7  ;;  %v119_v11 = vadd.f32 %v111_v9, %v95_v8  ;;  %v112_v15 = vld [vmem:[#allocation3 + $0x28] sm:$0xff]  ;;  %v124_v16 = vadd.f32 %v116_v13, %v100_v12  ;;  %v101_v18 = vld [vmem:[#allocation3 + $0x70] sm:$0xff]  ;;  %v117_v19 = vld [vmem:[#allocation3 + $0x78] sm:$0xff]  ;;  %v249_v59 = vadd.s32 4294967288, %v244_v56  ;;  %v256_v60 = vadd.s32 4294967280, %v244_v56  ;;  %s1008_s20 = sshll.u32 %s1465_s19, 4  ;;  %s1009_s20 = int_to_ptr.vmem [resolvable:$true] %s1008_s20 }
  0x50   :  { %v120_v17 = vadd.f32 %v112_v15, %v96_v14  ;;  %v97_v20 = vld [vmem:[#allocation3 + $0x30] sm:$0xff]  ;;  %v113_v21 = vld [vmem:[#allocation3 + $0x38] sm:$0xff]  ;;  %v125_v22 = vadd.f32 %v117_v19, %v101_v18  ;;  %v162_v24 = vld [vmem:[#allocation6 + $0x8] sm:$0xff]  ;;  %v263_v1 = vadd.s32 4294967272, %v244_v56  ;;  %v247_v3 = vsub.s32 %v244_v56, %v1553_v61  ;;  %s1424_s21 = scalar_lea.vmem %s1009_s20, 32  ;;  %p1429_p5 = scmp.lt.s32.totalorder %s1009_s20, %s1009_s20 }
  0x51   :  { %v121_v23 = vadd.f32 %v113_v21, %v97_v20  ;;  %v170_v25 = vld [vmem:[#allocation6 + $0x48] sm:$0xff]  ;;  %v164_v26 = vld [vmem:[#allocation6 + $0x18] sm:$0xff]  ;;  %v161_v29 = vld [vmem:[#allocation6] sm:$0xff]  ;;  %v252_v63 = vsub.s32 %v249_v59, %v1553_v61  ;;  %v259_v2 = vsub.s32 %v256_v60, %v1553_v61  ;;  %p1425_p4 = scmp.ne.s32.totalorder %s1009_s20, %s1424_s21  ;;  %p1430_p6 = scmp.lt.s32.totalorder %s1424_s21, %s1424_s21 }
  0x52   :  { %155 = vadd.xlane.f32.xlu1 %v123_v10  ;;  %v1164_v27 = vpack.c.bf16 %v170_v25, %v162_v24  ;;  %v172_v28 = vld [vmem:[#allocation6 + $0x58] sm:$0xff]  ;;  %v169_v30 = vld [vmem:[#allocation6 + $0x40] sm:$0xff]  ;;  %v163_v33 = vld [vmem:[#allocation6 + $0x10] sm:$0xff]  ;;  %v266_v7 = vsub.s32 %v263_v1, %v1553_v61 }
  0x53   :  { %147 = vadd.xlane.f32.xlu0 %v119_v11  ;;  %v1172_v31 = vpack.c.bf16 %v172_v28, %v164_v26  ;;  %v1166_v32 = vpack.c.bf16 %v169_v30, %v161_v29  ;;  %v171_v34 = vld [vmem:[#allocation6 + $0x50] sm:$0xff]  ;;  %v178_v36 = vld [vmem:[#allocation6 + $0x88] sm:$0xff]  ;;  %v180_v38 = vld [vmem:[#allocation6 + $0x98] sm:$0xff]  ;;  %p1431_p7 = por %p1430_p6, %p1429_p5 }
  0x54   :  { %1165 = vmatprep.subr.bf16.mxu0 %v1164_v27  ;;  %v1174_v35 = vpack.c.bf16 %v171_v34, %v163_v33  ;;  %v186_v37 = vld [vmem:[#allocation6 + $0xc8] sm:$0xff]  ;;  %v188_v40 = vld [vmem:[#allocation6 + $0xd8] sm:$0xff]  ;;  %v177_v41 = vld [vmem:[#allocation6 + $0x80] sm:$0xff] }
  0x55   :  { %1173 = vmatprep.subr.bf16.mxu1 %v1172_v31  ;;  %1167 = vmatpush1.bf16.msra.mxu0 %v1166_v32  ;;  %v1168_v39 = vpack.c.bf16 %v186_v37, %v178_v36  ;;  %v185_v42 = vld [vmem:[#allocation6 + $0xc0] sm:$0xff]  ;;  %v1176_v43 = vpack.c.bf16 %v188_v40, %v180_v38  ;;  %v179_v45 = vld [vmem:[#allocation6 + $0x90] sm:$0xff]  ;;  %v166_v48 = vld [vmem:[#allocation6 + $0x28] sm:$0xff]  ;;  %p1432_p8 = pnand %p1431_p7, %p1425_p4 }
  0x56   :  { %157 = vadd.xlane.f32.xlu1 %v124_v16  ;;  %1175 = vmatpush1.bf16.msra.mxu1 %v1174_v35  ;;  %v1170_v44 = vpack.c.bf16 %v185_v42, %v177_v41  ;;  %v187_v46 = vld [vmem:[#allocation6 + $0xd0] sm:$0xff]  ;;  %v174_v49 = vld [vmem:[#allocation6 + $0x68] sm:$0xff]  ;;  %v168_v50 = vld [vmem:[#allocation6 + $0x38] sm:$0xff] }
  0x57   :  { %149 = vadd.xlane.f32.xlu0 %v120_v17  ;;  %1169 = vmatprep.subr.bf16.mxu0 %v1168_v39  ;;  %v1178_v47 = vpack.c.bf16 %v187_v46, %v179_v45  ;;  %v1180_v51 = vpack.c.bf16 %v174_v49, %v166_v48  ;;  %v176_v52 = vld [vmem:[#allocation6 + $0x78] sm:$0xff]  ;;  %v165_v12 = vld [vmem:[#allocation6 + $0x20] sm:$0xff]  ;;  %v167_v16 = vld [vmem:[#allocation6 + $0x30] sm:$0xff] }
  0x58   :  { %1177 = vmatprep.subr.bf16.mxu1 %v1176_v43  ;;  %v1188_v53 = vpack.c.bf16 %v176_v52, %v168_v50  ;;  %v173_v13 = vld [vmem:[#allocation6 + $0x60] sm:$0xff]  ;;  %v175_v17 = vld [vmem:[#allocation6 + $0x70] sm:$0xff]  ;;  %v182_v18 = vld [vmem:[#allocation6 + $0xa8] sm:$0xff] }
  0x59   :  { %1171 = vmatpush1.bf16.msra.mxu0 %v1170_v44  ;;  %v192_v24 = vld [vmem:[#allocation6 + $0xf8] sm:$0xff]  ;;  %v1182_v28 = vpack.c.bf16 %v173_v13, %v165_v12  ;;  %v1190_v31 = vpack.c.bf16 %v175_v17, %v167_v16  ;;  %v181_v32 = vld [vmem:[#allocation6 + $0xa0] sm:$0xff]  ;;  %v183_v37 = vld [vmem:[#allocation6 + $0xb0] sm:$0xff] }
  0x5a   :  { %159 = vadd.xlane.f32.xlu1 %v125_v22  ;;  %1179 = vmatpush1.bf16.msra.mxu1 %v1178_v47  ;;  %v190_v22 = vld [vmem:[#allocation6 + $0xe8] sm:$0xff]  ;;  %v189_v33 = vld [vmem:[#allocation6 + $0xe0] sm:$0xff]  ;;  %v191_v38 = vld [vmem:[#allocation6 + $0xf0] sm:$0xff] }
  0x5b   :  { %151 = vadd.xlane.f32.xlu0 %v121_v23  ;;  %1181 = vmatprep.subr.bf16.mxu0 %v1180_v51  ;;  %v184_v23 = vld [vmem:[#allocation6 + $0xb8] sm:$0xff]  ;;  %v1184_v35 = vpack.c.bf16 %v190_v22, %v182_v18  ;;  %v602_v39 = vld [vmem:[#allocation9 + $0x80] sm:$0xff]  ;;  %v603_v41 = vld [vmem:[#allocation9 + $0x88] sm:$0xff]  ;;  %v1186_v44 = vpack.c.bf16 %v189_v33, %v181_v32  ;;  %v1194_v45 = vpack.c.bf16 %v191_v38, %v183_v37 }
  0x5c   :  { %1189 = vmatprep.subr.bf16.mxu1 %v1188_v53  ;;  %v1192_v36 = vpack.c.bf16 %v192_v24, %v184_v23  ;;  %v634_v42 = vld [vmem:[#allocation9 + $0x180] sm:$0xff]  ;;  %v635_v43 = vld [vmem:[#allocation9 + $0x188] sm:$0xff]  ;;  %v1196_v48 = vpack.c.bf16 %v603_v41, %v602_v39  ;;  %v604_v52 = vld [vmem:[#allocation9 + $0x90] sm:$0xff] }
  0x5d   :  { %v586_v46 = vld [vmem:[#allocation9] sm:$0xff]  ;;  %v587_v47 = vld [vmem:[#allocation9 + $0x8] sm:$0xff]  ;;  %v1228_v49 = vpack.c.bf16 %v635_v43, %v634_v42  ;;  %v605_v53 = vld [vmem:[#allocation9 + $0x98] sm:$0xff] }
  0x5e   :  { %v618_v50 = vld [vmem:[#allocation9 + $0x100] sm:$0xff]  ;;  %v619_v51 = vld [vmem:[#allocation9 + $0x108] sm:$0xff]  ;;  %v636_v55 = vld [vmem:[#allocation9 + $0x190] sm:$0xff] }
  0x5f   :  { %v637_v56 = vld [vmem:[#allocation9 + $0x198] sm:$0xff]  ;;  %v588_v59 = vld [vmem:[#allocation9 + $0x10] sm:$0xff]  ;;  %v623_v12 = vld [vmem:[#allocation9 + $0x128] sm:$0xff] }
  0x60   :  { %v589_v60 = vld [vmem:[#allocation9 + $0x18] sm:$0xff]  ;;  %v608_v13 = vld [vmem:[#allocation9 + $0xb0] sm:$0xff]  ;;  %v595_v32 = vld [vmem:[#allocation9 + $0x48] sm:$0xff] }
  0x61   :  { %v621_v1 = vld [vmem:[#allocation9 + $0x118] sm:$0xff]  ;;  %v624_v23 = vld [vmem:[#allocation9 + $0x130] sm:$0xff] }
  0x62   :  { %v641_v16 = vld [vmem:[#allocation9 + $0x1b8] sm:$0xff]  ;;  %v612_v37 = vld [vmem:[#allocation9 + $0xd0] sm:$0xff] }
  0x63   :  { %v625_v24 = vld [vmem:[#allocation9 + $0x138] sm:$0xff]  ;;  %v644_v39 = vld [vmem:[#allocation9 + $0x1d0] sm:$0xff] }
  0x64   :  { %v613_v38 = vld [vmem:[#allocation9 + $0xd8] sm:$0xff]  ;;  %v596_v43 = vld [vmem:[#allocation9 + $0x50] sm:$0xff] }
  0xdb   :  { %v154_v57 = vpop.xlane.xlu1 %153 }
  0xdc   :  { %v146_v58 = vpop.xlane.xlu0 %145  ;;  %v273_v10 = vrot.slane %v154_v57, %v247_v3  ;;  %v1198_v57 = vpack.c.bf16 %v587_v47, %v586_v46  ;;  %v628_v47 = vld [vmem:[#allocation9 + $0x150] sm:$0xff] }
  0xdd   :  { %v248_v14 = vrot.slane %v146_v58, %v247_v3  ;;  %v1230_v58 = vpack.c.bf16 %v619_v51, %v618_v50  ;;  %v607_v3 = vld [vmem:[#allocation9 + $0xa8] sm:$0xff]  ;;  %v646_v51 = vld [vmem:[#allocation9 + $0x1e0] sm:$0xff] }
  0xde   :  { %v615_v50 = vld [vmem:[#allocation9 + $0xe8] sm:$0xff] }
  0xdf   :  { %v156_v62 = vpop.xlane.xlu1 %155 }
  0xe0   :  { %v148_v0 = vpop.xlane.xlu0 %147  ;;  %v277_v5 = vrot.slane %v156_v62, %v252_v63  ;;  %v1200_v62 = vpack.c.bf16 %v605_v53, %v604_v52  ;;  %v647_v52 = vld [vmem:[#allocation9 + $0x1e8] sm:$0xff] }
  0xe1   :  { %v253_v8 = vrot.slane %v148_v0, %v252_v63  ;;  %v1232_v63 = vpack.c.bf16 %v637_v56, %v636_v55  ;;  %v620_v0 = vld [vmem:[#allocation9 + $0x110] sm:$0xff]  ;;  %v598_v56 = vld [vmem:[#allocation9 + $0x60] sm:$0xff] }
  0xe2   :  { %v278_v19 = vsel %vm254_vm0, %v277_v5, %v273_v10  ;;  %v639_v5 = vld [vmem:[#allocation9 + $0x1a8] sm:$0xff] }
  0xe3   :  { %v158_v4 = vpop.xlane.xlu1 %157  ;;  %v255_v25 = vsel %vm254_vm0, %v253_v8, %v248_v14  ;;  %v591_v8 = vld [vmem:[#allocation9 + $0x28] sm:$0xff]  ;;  %v609_v14 = vld [vmem:[#allocation9 + $0xb8] sm:$0xff] }
  0xe4   :  { %v150_v6 = vpop.xlane.xlu0 %149  ;;  %v282_v9 = vrot.slane %v158_v4, %v259_v2  ;;  %v638_v4 = vld [vmem:[#allocation9 + $0x1a0] sm:$0xff] }
  0xe5   :  { %v260_v11 = vrot.slane %v150_v6, %v259_v2  ;;  %v606_v2 = vld [vmem:[#allocation9 + $0xa0] sm:$0xff]  ;;  %v1234_v6 = vpack.c.bf16 %v621_v1, %v620_v0  ;;  %v1236_v10 = vpack.c.bf16 %v639_v5, %v638_v4  ;;  %v616_v1 = vld [vmem:[#allocation9 + $0xf0] sm:$0xff]  ;;  %v649_v5 = vld [vmem:[#allocation9 + $0x1f8] sm:$0xff] }
  0xe6   :  { %v283_v26 = vsel %vm261_vm1, %v282_v9, %v278_v19  ;;  %v1204_v9 = vpack.c.bf16 %v607_v3, %v606_v2  ;;  %v592_v19 = vld [vmem:[#allocation9 + $0x30] sm:$0xff]  ;;  %v617_v2 = vld [vmem:[#allocation9 + $0xf8] sm:$0xff] }
  0xe7   :  { %v160_v15 = vpop.xlane.xlu1 %159  ;;  %v262_v29 = vsel %vm261_vm1, %v260_v11, %v255_v25  ;;  %v622_v11 = vld [vmem:[#allocation9 + $0x120] sm:$0xff]  ;;  %v648_v3 = vld [vmem:[#allocation9 + $0x1f0] sm:$0xff]  ;;  %v1224_v4 = vpack.c.bf16 %v617_v2, %v616_v1 }
  0xe8   :  { %v287_v20 = vrot.slane %v160_v15, %v266_v7  ;;  %v152_v21 = vpop.xlane.xlu0 %151  ;;  %v640_v15 = vld [vmem:[#allocation9 + $0x1b0] sm:$0xff]  ;;  %v1238_v18 = vpack.c.bf16 %v623_v12, %v622_v11  ;;  %v610_v25 = vld [vmem:[#allocation9 + $0xc0] sm:$0xff] }
  0xe9   :  { %v267_v27 = vrot.slane %v152_v21, %v266_v7  ;;  %v590_v7 = vld [vmem:[#allocation9 + $0x20] sm:$0xff]  ;;  %v1208_v21 = vpack.c.bf16 %v609_v14, %v608_v13  ;;  %v1240_v22 = vpack.c.bf16 %v641_v16, %v640_v15  ;;  %v667_v13 = vld [vmem:[#allocation9 + $0x288] sm:$0xff] }
  0xea   :  { %v288_v30 = vsel %vm268_vm2, %v287_v20, %v283_v26  ;;  %v1206_v17 = vpack.c.bf16 %v591_v8, %v590_v7  ;;  %v593_v20 = vld [vmem:[#allocation9 + $0x38] sm:$0xff]  ;;  %v611_v26 = vld [vmem:[#allocation9 + $0xc8] sm:$0xff]  ;;  %v1256_v7 = vpack.c.bf16 %v649_v5, %v648_v3  ;;  %v666_v12 = vld [vmem:[#allocation9 + $0x280] sm:$0xff] }
  0xeb   :  { %v269_v34 = vsel %vm268_vm2, %v267_v27, %v262_v29  ;;  %v642_v27 = vld [vmem:[#allocation9 + $0x1c0] sm:$0xff]  ;;  %v1210_v29 = vpack.c.bf16 %v593_v20, %v592_v19  ;;  %v1212_v33 = vpack.c.bf16 %v611_v26, %v610_v25  ;;  %v1260_v15 = vpack.c.bf16 %v667_v13, %v666_v12  ;;  %v699_v16 = vld [vmem:[#allocation9 + $0x388] sm:$0xff]  ;;  %v1574_v20 = vld [vmem:[#allocation8] sm:$0xff] }
  0xec   :  { %v290_v40 = vsel %vm289_vm3, %v288_v30, %v269_v34  ;;  %v1242_v30 = vpack.c.bf16 %v625_v24, %v624_v23  ;;  %v698_v14 = vld [vmem:[#allocation9 + $0x380] sm:$0xff]  ;;  %v205_v19 = vsub.s32 2, %v1553_v61  ;;  %v672_v12 = vld [vmem:[#allocation9 + $0x2b0] sm:$0xff] }
  0xed   :  { %1019 = vmatmul.mubr.msk.f32.vlgmr.msra.gmra.mrb[0].mxu0 %vm291_vm4, %v290_v40  ;;  %1020 = vmatmul.mubr.msk.f32.vlgmr.msra.gmra.mrb[0].mxu1 %vm291_vm4, %v290_v40  ;;  %v654_v5 = vld [vmem:[#allocation9 + $0x220] sm:$0xff] }
  0xee   :  { %1183 = vmatpush1.bf16.msra.mxu0 %v1182_v28  ;;  %1191 = vmatpush1.bf16.msra.mxu1 %v1190_v31  ;;  %v643_v28 = vld [vmem:[#allocation9 + $0x1c8] sm:$0xff]  ;;  %v594_v31 = vld [vmem:[#allocation9 + $0x40] sm:$0xff]  ;;  %v206_v24 = vrot.slane %v1574_v20, %v205_v19 }
  0xef   :  { %1185 = vmatprep.subr.bf16.mxu0 %v1184_v35  ;;  %1193 = vmatprep.subr.bf16.mxu1 %v1192_v36  ;;  %v1244_v34 = vpack.c.bf16 %v643_v28, %v642_v27  ;;  %v626_v35 = vld [vmem:[#allocation9 + $0x140] sm:$0xff]  ;;  %v627_v36 = vld [vmem:[#allocation9 + $0x148] sm:$0xff]  ;;  %v1214_v41 = vpack.c.bf16 %v595_v32, %v594_v31 }
  0xf0   :  { %500 = vmatprep.mubr.f32.mxu0 %v1464_v54  ;;  %571 = vmatprep.mubr.f32.mxu1 %v1464_v54  ;;  %v1202_v54 = vpack.c.bf16 %v589_v60, %v588_v59  ;;  %v1246_v42 = vpack.c.bf16 %v627_v36, %v626_v35  ;;  %v599_v59 = vld [vmem:[#allocation9 + $0x68] sm:$0xff]  ;;  %v630_v60 = vld [vmem:[#allocation9 + $0x160] sm:$0xff] }
  0xf1   :  { %v682_v35 = vld [vmem:[#allocation9 + $0x300] sm:$0xff]  ;;  %v683_v36 = vld [vmem:[#allocation9 + $0x308] sm:$0xff] }
  0xf2   :  { %1187 = vmatpush1.bf16.msra.mxu0 %v1186_v44  ;;  %1195 = vmatpush1.bf16.msra.mxu1 %v1194_v45  ;;  %v597_v44 = vld [vmem:[#allocation9 + $0x58] sm:$0xff]  ;;  %v1216_v45 = vpack.c.bf16 %v613_v38, %v612_v37  ;;  %v668_v37 = vld [vmem:[#allocation9 + $0x290] sm:$0xff] }
  0xf3   :  { %1197 = vmatprep.subr.bf16.mxu0 %v1196_v48  ;;  %1229 = vmatprep.subr.bf16.mxu1 %v1228_v49  ;;  %v629_v48 = vld [vmem:[#allocation9 + $0x158] sm:$0xff]  ;;  %v614_v49 = vld [vmem:[#allocation9 + $0xe0] sm:$0xff]  ;;  %v1218_v53 = vpack.c.bf16 %v597_v44, %v596_v43  ;;  %v700_v43 = vld [vmem:[#allocation9 + $0x390] sm:$0xff] }
  0xf4   :  { %v1250_v55 = vpack.c.bf16 %v629_v48, %v628_v47  ;;  %v701_v44 = vld [vmem:[#allocation9 + $0x398] sm:$0xff]  ;;  %v1294_v48 = vpack.c.bf16 %v683_v36, %v682_v35  ;;  %v658_v35 = vld [vmem:[#allocation9 + $0x240] sm:$0xff]  ;;  %v659_v36 = vld [vmem:[#allocation9 + $0x248] sm:$0xff] }
  0xf5   :  { %1021 = vmatmul.mubr.msk.f32.vlgmr.msra.gmra.mrb[2].mxu0 %vm291_vm4, %v290_v40  ;;  %1022 = vmatmul.mubr.msk.f32.vlgmr.msra.gmra.mrb[2].mxu1 %vm291_vm4, %v290_v40  ;;  %v645_v40 = vld [vmem:[#allocation9 + $0x1d8] sm:$0xff] }
  0xf6   :  { %1199 = vmatpush3.bf16.msra.mxu0 %v1198_v57  ;;  %1231 = vmatpush3.bf16.msra.mxu1 %v1230_v58  ;;  %v1248_v46 = vpack.c.bf16 %v645_v40, %v644_v39  ;;  %v1220_v57 = vpack.c.bf16 %v615_v50, %v614_v49  ;;  %v1252_v58 = vpack.c.bf16 %v647_v52, %v646_v51  ;;  %v217_v40 = vsub.s32 5, %v1553_v61  ;;  %v652_v49 = vld [vmem:[#allocation9 + $0x210] sm:$0xff]  ;;  %v653_v50 = vld [vmem:[#allocation9 + $0x218] sm:$0xff] }
  0xf7   :  { %1201 = vmatprep.subr.bf16.mxu0 %v1200_v62  ;;  %1233 = vmatprep.subr.bf16.mxu1 %v1232_v63  ;;  %v631_v62 = vld [vmem:[#allocation9 + $0x168] sm:$0xff]  ;;  %v1222_v63 = vpack.c.bf16 %v599_v59, %v598_v56  ;;  %v684_v56 = vld [vmem:[#allocation9 + $0x310] sm:$0xff]  ;;  %v1266_v3 = vpack.c.bf16 %v653_v50, %v652_v49 }
  0xf8   :  { %v1254_v0 = vpack.c.bf16 %v631_v62, %v630_v60  ;;  %v218_v59 = vrot.slane %v1574_v20, %v217_v40  ;;  %v671_v62 = vld [vmem:[#allocation9 + $0x2a8] sm:$0xff] }
  0xf9   :  { %v691_v40 = vld [vmem:[#allocation9 + $0x348] sm:$0xff] }
  0xfa   :  { %1203 = vmatpush3.bf16.msra.mxu0 %v1202_v54  ;;  %1235 = vmatpush3.bf16.msra.mxu1 %v1234_v6  ;;  %v600_v54 = vld [vmem:[#allocation9 + $0x70] sm:$0xff]  ;;  %v601_v6 = vld [vmem:[#allocation9 + $0x78] sm:$0xff] }
  0xfb   :  { %1205 = vmatprep.subr.bf16.mxu0 %v1204_v9  ;;  %1237 = vmatprep.subr.bf16.mxu1 %v1236_v10  ;;  %v1226_v8 = vpack.c.bf16 %v601_v6, %v600_v54  ;;  %v632_v9 = vld [vmem:[#allocation9 + $0x170] sm:$0xff]  ;;  %v633_v10 = vld [vmem:[#allocation9 + $0x178] sm:$0xff]  ;;  %v655_v54 = vld [vmem:[#allocation9 + $0x228] sm:$0xff] }
  0xfc   :  { %v1258_v11 = vpack.c.bf16 %v633_v10, %v632_v9  ;;  %v686_v10 = vld [vmem:[#allocation9 + $0x320] sm:$0xff] }
  0xfe   :  { %1207 = vmatpush3.bf16.msra.mxu0 %v1206_v17  ;;  %1239 = vmatpush3.bf16.msra.mxu1 %v1238_v18  ;;  %v1292_v17 = vpack.c.bf16 %v699_v16, %v698_v14  ;;  %v197_v18 = vsub.s32 0, %v1553_v61  ;;  %v704_v16 = vld [vmem:[#allocation9 + $0x3b0] sm:$0xff] }
  0xff   :  { %1209 = vmatprep.subr.bf16.mxu0 %v1208_v21  ;;  %1241 = vmatprep.subr.bf16.mxu1 %v1240_v22  ;;  %v201_v21 = vsub.s32 1, %v1553_v61  ;;  %v209_v22 = vsub.s32 3, %v1553_v61 }
 0x100   :  { %v198_v23 = vrot.slane %v1574_v20, %v197_v18 }
 0x101   :  { %v202_v25 = vrot.slane %v1574_v20, %v201_v21  ;;  %v210_v26 = vrot.slane %v1574_v20, %v209_v22  ;;  %v1270_v21 = vpack.c.bf16 %v655_v54, %v654_v5  ;;  %v694_v5 = vld [vmem:[#allocation9 + $0x360] sm:$0xff]  ;;  %v695_v54 = vld [vmem:[#allocation9 + $0x368] sm:$0xff] }
 0x102   :  { %1211 = vmatpush3.bf16.msra.mxu0 %v1210_v29  ;;  %1243 = vmatpush3.bf16.msra.mxu1 %v1242_v30  ;;  %v650_v29 = vld [vmem:[#allocation9 + $0x200] sm:$0xff]  ;;  %v651_v30 = vld [vmem:[#allocation9 + $0x208] sm:$0xff] }
 0x103   :  { %1213 = vmatprep.subr.bf16.mxu0 %v1212_v33  ;;  %1245 = vmatprep.subr.bf16.mxu1 %v1244_v34  ;;  %v1262_v47 = vpack.c.bf16 %v651_v30, %v650_v29  ;;  %v674_v29 = vld [vmem:[#allocation9 + $0x2c0] sm:$0xff]  ;;  %v675_v30 = vld [vmem:[#allocation9 + $0x2c8] sm:$0xff] }
 0x106   :  { %1215 = vmatpush3.bf16.msra.mxu0 %v1214_v41  ;;  %1247 = vmatpush3.bf16.msra.mxu1 %v1246_v42  ;;  %v225_v41 = vsub.s32 7, %v1553_v61  ;;  %v669_v42 = vld [vmem:[#allocation9 + $0x298] sm:$0xff] }
 0x107   :  { %1217 = vmatprep.subr.bf16.mxu0 %v1216_v45  ;;  %1249 = vmatprep.subr.bf16.mxu1 %v1248_v46 }
 0x108   :  { %v226_v60 = vrot.slane %v1574_v20, %v225_v41  ;;  %v676_v41 = vld [vmem:[#allocation9 + $0x2d0] sm:$0xff] }
 0x10a   :  { %1219 = vmatpush3.bf16.msra.mxu0 %v1218_v53  ;;  %1251 = vmatpush3.bf16.msra.mxu1 %v1250_v55  ;;  %v1264_v53 = vpack.c.bf16 %v669_v42, %v668_v37  ;;  %v1296_v55 = vpack.c.bf16 %v701_v44, %v700_v43  ;;  %v1276_v37 = vpack.c.bf16 %v675_v30, %v674_v29  ;;  %v677_v42 = vld [vmem:[#allocation9 + $0x2d8] sm:$0xff]  ;;  %v708_v43 = vld [vmem:[#allocation9 + $0x3d0] sm:$0xff] }
 0x10b   :  { %1221 = vmatprep.subr.bf16.mxu0 %v1220_v57  ;;  %1253 = vmatprep.subr.bf16.mxu1 %v1252_v58  ;;  %v685_v57 = vld [vmem:[#allocation9 + $0x318] sm:$0xff]  ;;  %v670_v58 = vld [vmem:[#allocation9 + $0x2a0] sm:$0xff]  ;;  %v1280_v49 = vpack.c.bf16 %v677_v42, %v676_v41 }
 0x10c   :  { %v709_v44 = vld [vmem:[#allocation9 + $0x3d8] sm:$0xff] }
 0x10d   :  { %v1312_v50 = vpack.c.bf16 %v709_v44, %v708_v43 }
 0x10e   :  { %1223 = vmatpush3.bf16.msra.mxu0 %v1222_v63  ;;  %1255 = vmatpush3.bf16.msra.mxu1 %v1254_v0  ;;  %v702_v63 = vld [vmem:[#allocation9 + $0x3a0] sm:$0xff]  ;;  %v703_v0 = vld [vmem:[#allocation9 + $0x3a8] sm:$0xff] }
 0x10f   :  { %1225 = vmatprep.subr.bf16.mxu0 %v1224_v4  ;;  %1257 = vmatprep.subr.bf16.mxu1 %v1256_v7  ;;  %v1298_v4 = vpack.c.bf16 %v685_v57, %v684_v56  ;;  %v1300_v9 = vpack.c.bf16 %v703_v0, %v702_v63  ;;  %v710_v56 = vld [vmem:[#allocation9 + $0x3e0] sm:$0xff]  ;;  %v711_v57 = vld [vmem:[#allocation9 + $0x3e8] sm:$0xff]  ;;  %v221_v0 = vsub.s32 6, %v1553_v61 }
 0x110   :  { %v663_v63 = vld [vmem:[#allocation9 + $0x268] sm:$0xff] }
 0x112   :  { %1227 = vmatpush3.bf16.msra.mxu0 %v1226_v8  ;;  %1259 = vmatpush3.bf16.msra.mxu1 %v1258_v11  ;;  %v1268_v8 = vpack.c.bf16 %v671_v62, %v670_v58  ;;  %v687_v11 = vld [vmem:[#allocation9 + $0x328] sm:$0xff]  ;;  %v213_v58 = vsub.s32 4, %v1553_v61  ;;  %v662_v62 = vld [vmem:[#allocation9 + $0x260] sm:$0xff] }
 0x113   :  { %1261 = vmatprep.subr.bf16.mxu0 %v1260_v15  ;;  %1293 = vmatprep.subr.bf16.mxu1 %v1292_v17  ;;  %v673_v15 = vld [vmem:[#allocation9 + $0x2b8] sm:$0xff]  ;;  %v1302_v22 = vpack.c.bf16 %v687_v11, %v686_v10  ;;  %v1286_v11 = vpack.c.bf16 %v663_v63, %v662_v62 }
 0x114   :  { %v705_v17 = vld [vmem:[#allocation9 + $0x3b8] sm:$0xff]  ;;  %v214_v10 = vrot.slane %v1574_v20, %v213_v58 }
 0x1c0   :  { %v360_v27 = vpop.f32.mrb[0].mxu0  ;;  %v431_v28 = vpop.f32.mrb[0].mxu1 }
 0x1c1   :  { %v361_v31 = vadd.f32 %v360_v27, %v198_v23  ;;  %v432_v32 = vadd.f32 %v431_v28, %v206_v24  ;;  %v362_v33 = vpop.f32.mrb[1].mxu0  ;;  %v433_v34 = vpop.f32.mrb[1].mxu1  ;;  %v656_v23 = vld [vmem:[#allocation9 + $0x230] sm:$0xff]  ;;  %v657_v24 = vld [vmem:[#allocation9 + $0x238] sm:$0xff] }
 0x1c2   :  { %v363_v38 = vadd.f32 %v362_v33, %v202_v25  ;;  %v434_v39 = vadd.f32 %v433_v34, %v210_v26  ;;  %v1272_v25 = vpack.c.bf16 %v673_v15, %v672_v12  ;;  %v1304_v26 = vpack.c.bf16 %v705_v17, %v704_v16  ;;  %v688_v27 = vld [vmem:[#allocation9 + $0x330] sm:$0xff]  ;;  %v689_v28 = vld [vmem:[#allocation9 + $0x338] sm:$0xff] }
 0x1c3   :  { %v578_v51 = vmax.f32 %v361_v31, 0.0  ;;  %v580_v52 = vmax.f32 %v432_v32, 0.0  ;;  %v706_v31 = vld [vmem:[#allocation9 + $0x3c0] sm:$0xff]  ;;  %v707_v32 = vld [vmem:[#allocation9 + $0x3c8] sm:$0xff]  ;;  %v1274_v33 = vpack.c.bf16 %v657_v24, %v656_v23  ;;  %v1306_v34 = vpack.c.bf16 %v689_v28, %v688_v27  ;;  %v665_v16 = vld [vmem:[#allocation9 + $0x278] sm:$0xff] }
 0x1c4   :  { %v579_v45 = vmax.f32 %v363_v38, 0.0  ;;  %v581_v46 = vmax.f32 %v434_v39, 0.0  ;;  %v1308_v38 = vpack.c.bf16 %v707_v32, %v706_v31  ;;  %v690_v39 = vld [vmem:[#allocation9 + $0x340] sm:$0xff]  ;;  %v1318_v12 = vpack.c.bf16 %v695_v54, %v694_v5  ;;  %v696_v17 = vld [vmem:[#allocation9 + $0x370] sm:$0xff]  ;;  %v1023_v27 = vld [vmem:[%s1615_s4] ss:$0 sm:$0xff] }
 0x1c6   :  { %785 = vmatprep.mubr.f32.mxu0 %v579_v45  ;;  %855 = vmatprep.mubr.f32.mxu1 %v581_v46  ;;  %v1278_v45 = vpack.c.bf16 %v659_v36, %v658_v35  ;;  %v1310_v46 = vpack.c.bf16 %v691_v40, %v690_v39 }
 0x1c7   :  { %786 = vmatmul.mubr.f32.vlgmr.msra.gmra.mrb[4].mxu0 %v578_v51  ;;  %856 = vmatmul.mubr.f32.vlgmr.msra.gmra.mrb[4].mxu1 %v580_v52  ;;  %v692_v51 = vld [vmem:[#allocation9 + $0x350] sm:$0xff]  ;;  %v693_v52 = vld [vmem:[#allocation9 + $0x358] sm:$0xff] }
 0x1c8   :  { %v1586_v1 = vpop.f32.mrb[2].mxu0  ;;  %v1588_v2 = vpop.f32.mrb[2].mxu1  ;;  %1263 = vmatpush3.bf16.msra.mxu0 %v1262_v47  ;;  %1295 = vmatpush3.bf16.msra.mxu1 %v1294_v48  ;;  %v660_v47 = vld [vmem:[#allocation9 + $0x250] sm:$0xff]  ;;  %v661_v48 = vld [vmem:[#allocation9 + $0x258] sm:$0xff] }
 0x1c9   :  { %v504_v6 = vpop.f32.mrb[3].mxu0  ;;  %v575_v7 = vpop.f32.mrb[3].mxu1  ;;  %1265 = vmatprep.subr.bf16.mxu0 %v1264_v53  ;;  %1297 = vmatprep.subr.bf16.mxu1 %v1296_v55  ;;  %v678_v53 = vld [vmem:[#allocation9 + $0x2e0] sm:$0xff]  ;;  %v679_v55 = vld [vmem:[#allocation9 + $0x2e8] sm:$0xff] }
 0x1ca   :  { %v505_v13 = vadd.f32 %v504_v6, %v218_v59  ;;  %v576_v14 = vadd.f32 %v575_v7, %v226_v60  ;;  %v1282_v59 = vpack.c.bf16 %v661_v48, %v660_v47  ;;  %v1314_v60 = vpack.c.bf16 %v693_v52, %v692_v51  ;;  %v680_v6 = vld [vmem:[#allocation9 + $0x2f0] sm:$0xff]  ;;  %v681_v7 = vld [vmem:[#allocation9 + $0x2f8] sm:$0xff] }
 0x1cb   :  { %v1288_v61 = vpack.c.bf16 %v681_v7, %v680_v6 }
 0x1cc   :  { %v583_v18 = vmax.f32 %v505_v13, 0.0  ;;  %v585_v19 = vmax.f32 %v576_v14, 0.0  ;;  %1267 = vmatpush3.bf16.msra.mxu0 %v1266_v3  ;;  %1299 = vmatpush3.bf16.msra.mxu1 %v1298_v4  ;;  %v1284_v3 = vpack.c.bf16 %v679_v55, %v678_v53  ;;  %v1316_v4 = vpack.c.bf16 %v711_v57, %v710_v56  ;;  %v664_v13 = vld [vmem:[#allocation9 + $0x270] sm:$0xff] }
 0x1cd   :  { %1269 = vmatprep.subr.bf16.mxu0 %v1268_v8  ;;  %1301 = vmatprep.subr.bf16.mxu1 %v1300_v9  ;;  %v712_v8 = vld [vmem:[#allocation9 + $0x3f0] sm:$0xff]  ;;  %v713_v9 = vld [vmem:[#allocation9 + $0x3f8] sm:$0xff]  ;;  %v222_v14 = vrot.slane %v1574_v20, %v221_v0 }
 0x1ce   :  { %925 = vmatprep.mubr.f32.mxu0 %v583_v18  ;;  %995 = vmatprep.mubr.f32.mxu1 %v585_v19  ;;  %v1320_v15 = vpack.c.bf16 %v713_v9, %v712_v8  ;;  %v697_v18 = vld [vmem:[#allocation9 + $0x378] sm:$0xff]  ;;  %v1290_v19 = vpack.c.bf16 %v665_v16, %v664_v13 }
 0x1cf   :  { %v574_v23 = vadd.f32 %v1588_v2, %v222_v14 }
 0x1d0   :  { %1271 = vmatpush3.bf16.msra.mxu0 %v1270_v21  ;;  %1303 = vmatpush3.bf16.msra.mxu1 %v1302_v22  ;;  %v1322_v21 = vpack.c.bf16 %v697_v18, %v696_v17  ;;  %v503_v22 = vadd.f32 %v1586_v1, %v214_v10 }
 0x1d1   :  { %1273 = vmatprep.subr.bf16.mxu0 %v1272_v25  ;;  %1305 = vmatprep.subr.bf16.mxu1 %v1304_v26  ;;  %v584_v24 = vmax.f32 %v574_v23, 0.0 }
 0x1d2   :  { %v582_v20 = vmax.f32 %v503_v22, 0.0 }
 0x1d4   :  { %1275 = vmatpush3.bf16.msra.mxu0 %v1274_v33  ;;  %1307 = vmatpush3.bf16.msra.mxu1 %v1306_v34 }
 0x1d5   :  { %1277 = vmatprep.subr.bf16.mxu0 %v1276_v37  ;;  %1309 = vmatprep.subr.bf16.mxu1 %v1308_v38 }
 0x1d8   :  { %1279 = vmatpush3.bf16.msra.mxu0 %v1278_v45  ;;  %1311 = vmatpush3.bf16.msra.mxu1 %v1310_v46 }
 0x1d9   :  { %1281 = vmatprep.subr.bf16.mxu0 %v1280_v49  ;;  %1313 = vmatprep.subr.bf16.mxu1 %v1312_v50 }
 0x1dc   :  { %1283 = vmatpush3.bf16.msra.mxu0 %v1282_v59  ;;  %1315 = vmatpush3.bf16.msra.mxu1 %v1314_v60 }
 0x1dd   :  { %1285 = vmatprep.subr.bf16.mxu0 %v1284_v3  ;;  %1317 = vmatprep.subr.bf16.mxu1 %v1316_v4 }
 0x1e0   :  { %1287 = vmatpush3.bf16.msra.mxu0 %v1286_v11  ;;  %1319 = vmatpush3.bf16.msra.mxu1 %v1318_v12 }
 0x1e1   :  { %1289 = vmatprep.subr.bf16.mxu0 %v1288_v61  ;;  %1321 = vmatprep.subr.bf16.mxu1 %v1320_v15 }
 0x1e4   :  { %1291 = vmatpush3.bf16.msra.mxu0 %v1290_v19  ;;  %1323 = vmatpush3.bf16.msra.mxu1 %v1322_v21 }
 0x1e7   :  { %926 = vmatmul.mubr.f32.vlgmr.msra.gmra.mrb[6].mxu0 %v582_v20  ;;  %996 = vmatmul.mubr.f32.vlgmr.msra.gmra.mrb[6].mxu1 %v584_v24 }
 0x29a   :  { %v1056_v25 = vpop.f32.mrb[4].mxu0  ;;  %v1091_v26 = vpop.f32.mrb[4].mxu1 }
 0x29b   :  { %v1057_v28 = vpop.f32.mrb[5].mxu0  ;;  %v1092_v29 = vpop.f32.mrb[5].mxu1 }
 0x29c   :  { %v1058_v30 = vadd.f32 %v1057_v28, %v1056_v25  ;;  %v1093_v1 = vadd.f32 %v1092_v29, %v1091_v26 }
 0x29e   :  { %v788_v31 = vadd.f32 %v1058_v30, %v1023_v27 }
 0x2a0   :  { %v858_v2 = vadd.f32 %v1093_v1, %v788_v31 }
 0x2ba   :  { %v1126_v32 = vpop.f32.mrb[6].mxu0  ;;  %v1161_v33 = vpop.f32.mrb[6].mxu1 }
 0x2bb   :  { %v1127_v34 = vpop.f32.mrb[7].mxu0  ;;  %v1162_v35 = vpop.f32.mrb[7].mxu1 }
 0x2bc   :  { %v1128_v36 = vadd.f32 %v1127_v34, %v1126_v32  ;;  %v1163_v37 = vadd.f32 %v1162_v35, %v1161_v33 }
 0x2be   :  { %v928_v38 = vadd.f32 %v1128_v36, %v858_v2 }
 0x2c0   :  { %v998_v39 = vadd.f32 %v1163_v37, %v928_v38 }
 0x2c2   :  { %1001 = vst [vmem:[#allocation11] sm:$0x3] %v998_v39 }
 0x2c3   :  { %1435 = shalt.err (!%p1432_p8)
}
 0x2c4   :  { %s1436_s23 = scalar_lea.hbm %s1616_s5, 32 }
 0x2c5   :  { %p1437_p9 = scmp.ne.s32.totalorder %s1616_s5, %s1436_s23  ;;  %p1440_p10 = scmp.lt.u32.totalorder %s1436_s23, %s1616_s5 }
 0x2c7   :  { %p1442_p11 = pnand %p1440_p10, %p1437_p9 }
 0x2c9   :  { %1445 = shalt.err (!%p1442_p11)
}
 0x2ca   :  { %1011 = dma.vmem_to_hbm [thread:$0]  %s1009_s20, 32, %s1616_s5, [#allocation5]  }
 0x2cb   :  { %1452 = dma.done.wait [#allocation5], 32  }
 0x2cc   :  { %1453 = vsyncadd [#allocation5], 4294967264 }
 0x2cd   :  { %1015 = vsyncpa [#allocation4], 1 }
 0x2ce   :  { %1016 = vsyncpa [#allocation7], 1 }
 0x2cf   :  { %1017 = vsyncpa [#allocation10], 1 }
 0x2d0   :  { %1018 = vsyncpa [#allocation5], 1 }

// kernel: tpu_custom_call.1
= control target key start
LH: loop header
LB: loop body
LE: loop exit
PB: predicated region body
PF: predicated region fallthrough
CT: control target
= control target key end

     0   :  { %10 = vsyncpa [#allocation4], 0  ;;  %s1611_s0 = inlined_call_operand.hbm [shape: f32[2,32,256], index: 0, kind: input, shape index: {}]   ;;  %s1612_s1 = inlined_call_operand.hbm [shape: f32[32,1024], index: 1, kind: input, shape index: {}]   ;;  %s1613_s2 = inlined_call_operand.hbm [shape: f32[1,1024], index: 2, kind: input, shape index: {}]   ;;  %s1614_s3 = inlined_call_operand.hbm [shape: f32[1024,128], index: 3, kind: input, shape index: {}]   ;;  %s1615_s4 = inlined_call_operand.vmem [shape: f32[1,128], index: 4, kind: input, shape index: {}]   ;;  %s1616_s5 = inlined_call_operand.hbm [shape: f32[2,128], index: 5, kind: output, shape index: {}]  }
   0x1   :  { %11 = vsyncpa [#allocation7], 0 }
   0x2   :  { %12 = vsyncpa [#allocation10], 0 }
   0x3   :  { %13 = vsyncpa [#allocation5], 0  ;;  %s1454_s18 = smov [#allocation6]   ;;  %s1336_s22 = scalar_lea.hbm %s1612_s1, 4096 }
   0x4   :  { %s31_s19 = sshll.u32 %s1454_s18, 4  ;;  %p1337_p0 = scmp.ne.s32.totalorder %s1612_s1, %s1336_s22  ;;  %s32_s19 = int_to_ptr.vmem [resolvable:$true] %s31_s19 }
   0x5   :  { %p1340_p1 = scmp.lt.u32.totalorder %s1336_s22, %s1612_s1 }
   0x7   :  { %p1342_p2 = pnand %p1340_p1, %p1337_p0 }
   0x9   :  { %1345 = shalt.err (!%p1342_p2)
}
   0xa   :  { %s1346_s27 = scalar_lea.vmem %s32_s19, 4096  ;;  %p1351_p4 = scmp.lt.s32.totalorder %s32_s19, %s32_s19 }
   0xb   :  { %p1347_p3 = scmp.ne.s32.totalorder %s32_s19, %s1346_s27  ;;  %p1352_p5 = scmp.lt.s32.totalorder %s1346_s27, %s1346_s27 }
   0xd   :  { %p1353_p6 = por %p1352_p5, %p1351_p4 }
   0xf   :  { %p1354_p7 = pnand %p1353_p6, %p1347_p3 }
  0x11   :  { %1357 = shalt.err (!%p1354_p7)
}
  0x12   :  { %s1455_s28 = smov 1024   ;;  %s1456_s29 = smov 64  }
  0x13   :  { %37 = dma.hbm_to_vmem [thread:$0]  %s1612_s1, 4096, %s32_s19, [#allocation7], %s1455_s28, %s1455_s28, %s1456_s29  }
  0x14   :  { %s1457_s7 = smov [#allocation3]   ;;  %s1358_s11 = scalar_lea.hbm %s1611_s0, 2048 }
  0x15   :  { %s19_s8 = sshll.u32 %s1457_s7, 4  ;;  %p1359_p8 = scmp.ne.s32.totalorder %s1611_s0, %s1358_s11  ;;  %s20_s8 = int_to_ptr.vmem [resolvable:$true] %s19_s8 }
  0x16   :  { %p1362_p9 = scmp.lt.u32.totalorder %s1358_s11, %s1611_s0 }
  0x18   :  { %p1364_p10 = pnand %p1362_p9, %p1359_p8 }
  0x1a   :  { %1367 = shalt.err (!%p1364_p10)
}
  0x1b   :  { %s1368_s16 = scalar_lea.vmem %s20_s8, 2048  ;;  %p1373_p12 = scmp.lt.s32.totalorder %s20_s8, %s20_s8 }
  0x1c   :  { %p1369_p11 = scmp.ne.s32.totalorder %s20_s8, %s1368_s16  ;;  %p1374_p13 = scmp.lt.s32.totalorder %s1368_s16, %s1368_s16 }
  0x1e   :  { %p1375_p0 = por %p1374_p13, %p1373_p12 }
  0x20   :  { %p1376_p1 = pnand %p1375_p0, %p1369_p11 }
  0x22   :  { %1379 = shalt.err (!%p1376_p1)
}
  0x23   :  { %s1458_s1 = smov 256   ;;  %s1459_s17 = smov 16  }
  0x24   :  { %25 = dma.hbm_to_vmem [thread:$0]  %s1611_s0, 2048, %s20_s8, [#allocation4], %s1458_s1, %s1458_s1, %s1459_s17  }
  0x25   :  { %s1460_s20 = smov [#allocation8]   ;;  %s1461_s22 = smov [#allocation9]  }
  0x26   :  { %s44_s21 = sshll.u32 %s1460_s20, 4  ;;  %s53_s23 = sshll.u32 %s1461_s22, 4  ;;  %s45_s21 = int_to_ptr.vmem [resolvable:$true] %s44_s21  ;;  %s1520_s23 = int_to_ptr.vmem [resolvable:$true] %s53_s23 }
  0x27   :  { %s1380_s26 = scalar_lea.hbm %s1613_s2, 128 }
  0x28   :  { %p1381_p2 = scmp.ne.s32.totalorder %s1613_s2, %s1380_s26  ;;  %p1384_p3 = scmp.lt.u32.totalorder %s1380_s26, %s1613_s2 }
  0x2a   :  { %p1386_p4 = pnand %p1384_p3, %p1381_p2 }
  0x2c   :  { %1389 = shalt.err (!%p1386_p4)
}
  0x2d   :  { %s1390_s0 = scalar_lea.vmem %s45_s21, 128  ;;  %p1395_p6 = scmp.lt.s32.totalorder %s45_s21, %s45_s21 }
  0x2e   :  { %p1391_p5 = scmp.ne.s32.totalorder %s45_s21, %s1390_s0  ;;  %p1396_p7 = scmp.lt.s32.totalorder %s1390_s0, %s1390_s0 }
  0x30   :  { %p1397_p8 = por %p1396_p7, %p1395_p6 }
  0x32   :  { %p1398_p9 = pnand %p1397_p8, %p1391_p5 }
  0x34   :  { %1401 = shalt.err (!%p1398_p9)
}
  0x35   :  { %47 = dma.hbm_to_vmem [thread:$0]  %s1613_s2, 128, %s45_s21, [#allocation7]  }
  0x36   :  { %s1402_s10 = scalar_lea.hbm %s1614_s3, 16384 }
  0x37   :  { %p1403_p10 = scmp.ne.s32.totalorder %s1614_s3, %s1402_s10  ;;  %p1406_p11 = scmp.lt.u32.totalorder %s1402_s10, %s1614_s3 }
  0x39   :  { %p1408_p12 = pnand %p1406_p11, %p1403_p10 }
  0x3b   :  { %1411 = shalt.err (!%p1408_p12)
}
  0x3c   :  { %s1412_s15 = scalar_lea.vmem %s1520_s23, 16384  ;;  %p1417_p0 = scmp.lt.s32.totalorder %s1520_s23, %s1520_s23 }
  0x3d   :  { %p1413_p13 = scmp.ne.s32.totalorder %s1520_s23, %s1412_s15  ;;  %p1418_p1 = scmp.lt.s32.totalorder %s1412_s15, %s1412_s15 }
  0x3f   :  { %p1419_p2 = por %p1418_p1, %p1417_p0 }
  0x41   :  { %p1420_p3 = pnand %p1419_p2, %p1413_p13 }
  0x43   :  { %1423 = shalt.err (!%p1420_p3)
}
  0x44   :  { %s1462_s2 = smov 128   ;;  %s1463_s16 = smov 8  }
  0x45   :  { %59 = dma.hbm_to_vmem [thread:$0]  %s1614_s3, 16384, %s1520_s23, [#allocation10], %s1462_s2, %s1462_s2, %s1463_s16  }
  0x46   :  { %1446 = dma.done.wait [#allocation4], 2048  }
  0x47   :  { %1447 = vsyncadd [#allocation4], 4294965248 }
  0x48   :  { %1448 = dma.done.wait [#allocation7], 4224  }
  0x49   :  { %1449 = vsyncadd [#allocation7], 4294963072 }
  0x4a   :  { %1450 = dma.done.wait [#allocation10], 16384  }
  0x4b   :  { %1451 = vsyncadd [#allocation10], 4294950912  ;;  %v98_v0 = vld [vmem:[#allocation3 + $0x40] sm:$0xff]  ;;  %v114_v1 = vld [vmem:[#allocation3 + $0x48] sm:$0xff]  ;;  %v1464_v54 = vmov 0.0   ;;  %v195_v55 = vlaneseq  ;;  %vm254_vm0 = vcmask 130112  }
  0x4c   :  { %v94_v2 = vld [vmem:[#allocation3] sm:$0xff]  ;;  %v122_v3 = vadd.f32 %v114_v1, %v98_v0  ;;  %v110_v4 = vld [vmem:[#allocation3 + $0x8] sm:$0xff]  ;;  %v99_v5 = vld [vmem:[#allocation3 + $0x50] sm:$0xff]  ;;  %358 = vmatprep.mubr.f32.mxu0 %v1464_v54  ;;  %429 = vmatprep.mubr.f32.mxu1 %v1464_v54  ;;  %vm261_vm1 = vcmask 195712   ;;  %vm268_vm2 = vcmask 261312   ;;  %vm289_vm3 = vcmask 1041409  }
  0x4d   :  { %v115_v6 = vld [vmem:[#allocation3 + $0x58] sm:$0xff]  ;;  %v118_v7 = vadd.f32 %v110_v4, %v94_v2  ;;  %v95_v8 = vld [vmem:[#allocation3 + $0x10] sm:$0xff]  ;;  %v100_v12 = vld [vmem:[#allocation3 + $0x60] sm:$0xff]  ;;  %v244_v56 = vand.u32 127, %v195_v55  ;;  %v1553_v61 = vshrl.u32 %v195_v55, 7  ;;  %vm291_vm4 = vcmask 261120  }
  0x4e   :  { %v111_v9 = vld [vmem:[#allocation3 + $0x18] sm:$0xff]  ;;  %153 = vadd.xlane.f32.xlu1 %v122_v3  ;;  %v123_v10 = vadd.f32 %v115_v6, %v99_v5  ;;  %v116_v13 = vld [vmem:[#allocation3 + $0x68] sm:$0xff]  ;;  %v96_v14 = vld [vmem:[#allocation3 + $0x20] sm:$0xff]  ;;  %s1465_s19 = smov [#allocation11]  }
  0x4f   :  { %145 = vadd.xlane.f32.xlu0 %v118_v7  ;;  %v119_v11 = vadd.f32 %v111_v9, %v95_v8  ;;  %v112_v15 = vld [vmem:[#allocation3 + $0x28] sm:$0xff]  ;;  %v124_v16 = vadd.f32 %v116_v13, %v100_v12  ;;  %v101_v18 = vld [vmem:[#allocation3 + $0x70] sm:$0xff]  ;;  %v117_v19 = vld [vmem:[#allocation3 + $0x78] sm:$0xff]  ;;  %v249_v59 = vadd.s32 4294967288, %v244_v56  ;;  %v256_v60 = vadd.s32 4294967280, %v244_v56  ;;  %s1008_s20 = sshll.u32 %s1465_s19, 4  ;;  %s1009_s20 = int_to_ptr.vmem [resolvable:$true] %s1008_s20 }
  0x50   :  { %v120_v17 = vadd.f32 %v112_v15, %v96_v14  ;;  %v97_v20 = vld [vmem:[#allocation3 + $0x30] sm:$0xff]  ;;  %v113_v21 = vld [vmem:[#allocation3 + $0x38] sm:$0xff]  ;;  %v125_v22 = vadd.f32 %v117_v19, %v101_v18  ;;  %v162_v24 = vld [vmem:[#allocation6 + $0x8] sm:$0xff]  ;;  %v263_v1 = vadd.s32 4294967272, %v244_v56  ;;  %v247_v3 = vsub.s32 %v244_v56, %v1553_v61  ;;  %s1424_s21 = scalar_lea.vmem %s1009_s20, 32  ;;  %p1429_p5 = scmp.lt.s32.totalorder %s1009_s20, %s1009_s20 }
  0x51   :  { %v121_v23 = vadd.f32 %v113_v21, %v97_v20  ;;  %v170_v25 = vld [vmem:[#allocation6 + $0x48] sm:$0xff]  ;;  %v164_v26 = vld [vmem:[#allocation6 + $0x18] sm:$0xff]  ;;  %v161_v29 = vld [vmem:[#allocation6] sm:$0xff]  ;;  %v252_v63 = vsub.s32 %v249_v59, %v1553_v61  ;;  %v259_v2 = vsub.s32 %v256_v60, %v1553_v61  ;;  %p1425_p4 = scmp.ne.s32.totalorder %s1009_s20, %s1424_s21  ;;  %p1430_p6 = scmp.lt.s32.totalorder %s1424_s21, %s1424_s21 }
  0x52   :  { %155 = vadd.xlane.f32.xlu1 %v123_v10  ;;  %v1164_v27 = vpack.c.bf16 %v170_v25, %v162_v24  ;;  %v172_v28 = vld [vmem:[#allocation6 + $0x58] sm:$0xff]  ;;  %v169_v30 = vld [vmem:[#allocation6 + $0x40] sm:$0xff]  ;;  %v163_v33 = vld [vmem:[#allocation6 + $0x10] sm:$0xff]  ;;  %v266_v7 = vsub.s32 %v263_v1, %v1553_v61 }
  0x53   :  { %147 = vadd.xlane.f32.xlu0 %v119_v11  ;;  %v1172_v31 = vpack.c.bf16 %v172_v28, %v164_v26  ;;  %v1166_v32 = vpack.c.bf16 %v169_v30, %v161_v29  ;;  %v171_v34 = vld [vmem:[#allocation6 + $0x50] sm:$0xff]  ;;  %v178_v36 = vld [vmem:[#allocation6 + $0x88] sm:$0xff]  ;;  %v180_v38 = vld [vmem:[#allocation6 + $0x98] sm:$0xff]  ;;  %p1431_p7 = por %p1430_p6, %p1429_p5 }
  0x54   :  { %1165 = vmatprep.subr.bf16.mxu0 %v1164_v27  ;;  %v1174_v35 = vpack.c.bf16 %v171_v34, %v163_v33  ;;  %v186_v37 = vld [vmem:[#allocation6 + $0xc8] sm:$0xff]  ;;  %v188_v40 = vld [vmem:[#allocation6 + $0xd8] sm:$0xff]  ;;  %v177_v41 = vld [vmem:[#allocation6 + $0x80] sm:$0xff] }
  0x55   :  { %1173 = vmatprep.subr.bf16.mxu1 %v1172_v31  ;;  %1167 = vmatpush1.bf16.msra.mxu0 %v1166_v32  ;;  %v1168_v39 = vpack.c.bf16 %v186_v37, %v178_v36  ;;  %v185_v42 = vld [vmem:[#allocation6 + $0xc0] sm:$0xff]  ;;  %v1176_v43 = vpack.c.bf16 %v188_v40, %v180_v38  ;;  %v179_v45 = vld [vmem:[#allocation6 + $0x90] sm:$0xff]  ;;  %v166_v48 = vld [vmem:[#allocation6 + $0x28] sm:$0xff]  ;;  %p1432_p8 = pnand %p1431_p7, %p1425_p4 }
  0x56   :  { %157 = vadd.xlane.f32.xlu1 %v124_v16  ;;  %1175 = vmatpush1.bf16.msra.mxu1 %v1174_v35  ;;  %v1170_v44 = vpack.c.bf16 %v185_v42, %v177_v41  ;;  %v187_v46 = vld [vmem:[#allocation6 + $0xd0] sm:$0xff]  ;;  %v174_v49 = vld [vmem:[#allocation6 + $0x68] sm:$0xff]  ;;  %v168_v50 = vld [vmem:[#allocation6 + $0x38] sm:$0xff] }
  0x57   :  { %149 = vadd.xlane.f32.xlu0 %v120_v17  ;;  %1169 = vmatprep.subr.bf16.mxu0 %v1168_v39  ;;  %v1178_v47 = vpack.c.bf16 %v187_v46, %v179_v45  ;;  %v1180_v51 = vpack.c.bf16 %v174_v49, %v166_v48  ;;  %v176_v52 = vld [vmem:[#allocation6 + $0x78] sm:$0xff]  ;;  %v165_v12 = vld [vmem:[#allocation6 + $0x20] sm:$0xff]  ;;  %v167_v16 = vld [vmem:[#allocation6 + $0x30] sm:$0xff] }
  0x58   :  { %1177 = vmatprep.subr.bf16.mxu1 %v1176_v43  ;;  %v1188_v53 = vpack.c.bf16 %v176_v52, %v168_v50  ;;  %v173_v13 = vld [vmem:[#allocation6 + $0x60] sm:$0xff]  ;;  %v175_v17 = vld [vmem:[#allocation6 + $0x70] sm:$0xff]  ;;  %v182_v18 = vld [vmem:[#allocation6 + $0xa8] sm:$0xff] }
  0x59   :  { %1171 = vmatpush1.bf16.msra.mxu0 %v1170_v44  ;;  %v192_v24 = vld [vmem:[#allocation6 + $0xf8] sm:$0xff]  ;;  %v1182_v28 = vpack.c.bf16 %v173_v13, %v165_v12  ;;  %v1190_v31 = vpack.c.bf16 %v175_v17, %v167_v16  ;;  %v181_v32 = vld [vmem:[#allocation6 + $0xa0] sm:$0xff]  ;;  %v183_v37 = vld [vmem:[#allocation6 + $0xb0] sm:$0xff] }
  0x5a   :  { %159 = vadd.xlane.f32.xlu1 %v125_v22  ;;  %1179 = vmatpush1.bf16.msra.mxu1 %v1178_v47  ;;  %v190_v22 = vld [vmem:[#allocation6 + $0xe8] sm:$0xff]  ;;  %v189_v33 = vld [vmem:[#allocation6 + $0xe0] sm:$0xff]  ;;  %v191_v38 = vld [vmem:[#allocation6 + $0xf0] sm:$0xff] }
  0x5b   :  { %151 = vadd.xlane.f32.xlu0 %v121_v23  ;;  %1181 = vmatprep.subr.bf16.mxu0 %v1180_v51  ;;  %v184_v23 = vld [vmem:[#allocation6 + $0xb8] sm:$0xff]  ;;  %v1184_v35 = vpack.c.bf16 %v190_v22, %v182_v18  ;;  %v602_v39 = vld [vmem:[#allocation9 + $0x80] sm:$0xff]  ;;  %v603_v41 = vld [vmem:[#allocation9 + $0x88] sm:$0xff]  ;;  %v1186_v44 = vpack.c.bf16 %v189_v33, %v181_v32  ;;  %v1194_v45 = vpack.c.bf16 %v191_v38, %v183_v37 }
  0x5c   :  { %1189 = vmatprep.subr.bf16.mxu1 %v1188_v53  ;;  %v1192_v36 = vpack.c.bf16 %v192_v24, %v184_v23  ;;  %v634_v42 = vld [vmem:[#allocation9 + $0x180] sm:$0xff]  ;;  %v635_v43 = vld [vmem:[#allocation9 + $0x188] sm:$0xff]  ;;  %v1196_v48 = vpack.c.bf16 %v603_v41, %v602_v39  ;;  %v604_v52 = vld [vmem:[#allocation9 + $0x90] sm:$0xff] }
  0x5d   :  { %v586_v46 = vld [vmem:[#allocation9] sm:$0xff]  ;;  %v587_v47 = vld [vmem:[#allocation9 + $0x8] sm:$0xff]  ;;  %v1228_v49 = vpack.c.bf16 %v635_v43, %v634_v42  ;;  %v605_v53 = vld [vmem:[#allocation9 + $0x98] sm:$0xff] }
  0x5e   :  { %v618_v50 = vld [vmem:[#allocation9 + $0x100] sm:$0xff]  ;;  %v619_v51 = vld [vmem:[#allocation9 + $0x108] sm:$0xff]  ;;  %v636_v55 = vld [vmem:[#allocation9 + $0x190] sm:$0xff] }
  0x5f   :  { %v637_v56 = vld [vmem:[#allocation9 + $0x198] sm:$0xff]  ;;  %v588_v59 = vld [vmem:[#allocation9 + $0x10] sm:$0xff]  ;;  %v623_v12 = vld [vmem:[#allocation9 + $0x128] sm:$0xff] }
  0x60   :  { %v589_v60 = vld [vmem:[#allocation9 + $0x18] sm:$0xff]  ;;  %v608_v13 = vld [vmem:[#allocation9 + $0xb0] sm:$0xff]  ;;  %v595_v32 = vld [vmem:[#allocation9 + $0x48] sm:$0xff] }
  0x61   :  { %v621_v1 = vld [vmem:[#allocation9 + $0x118] sm:$0xff]  ;;  %v624_v23 = vld [vmem:[#allocation9 + $0x130] sm:$0xff] }
  0x62   :  { %v641_v16 = vld [vmem:[#allocation9 + $0x1b8] sm:$0xff]  ;;  %v612_v37 = vld [vmem:[#allocation9 + $0xd0] sm:$0xff] }
  0x63   :  { %v625_v24 = vld [vmem:[#allocation9 + $0x138] sm:$0xff]  ;;  %v644_v39 = vld [vmem:[#allocation9 + $0x1d0] sm:$0xff] }
  0x64   :  { %v613_v38 = vld [vmem:[#allocation9 + $0xd8] sm:$0xff]  ;;  %v596_v43 = vld [vmem:[#allocation9 + $0x50] sm:$0xff] }
  0xdb   :  { %v154_v57 = vpop.xlane.xlu1 %153 }
  0xdc   :  { %v146_v58 = vpop.xlane.xlu0 %145  ;;  %v273_v10 = vrot.slane %v154_v57, %v247_v3  ;;  %v1198_v57 = vpack.c.bf16 %v587_v47, %v586_v46  ;;  %v628_v47 = vld [vmem:[#allocation9 + $0x150] sm:$0xff] }
  0xdd   :  { %v248_v14 = vrot.slane %v146_v58, %v247_v3  ;;  %v1230_v58 = vpack.c.bf16 %v619_v51, %v618_v50  ;;  %v607_v3 = vld [vmem:[#allocation9 + $0xa8] sm:$0xff]  ;;  %v646_v51 = vld [vmem:[#allocation9 + $0x1e0] sm:$0xff] }
  0xde   :  { %v615_v50 = vld [vmem:[#allocation9 + $0xe8] sm:$0xff] }
  0xdf   :  { %v156_v62 = vpop.xlane.xlu1 %155 }
  0xe0   :  { %v148_v0 = vpop.xlane.xlu0 %147  ;;  %v277_v5 = vrot.slane %v156_v62, %v252_v63  ;;  %v1200_v62 = vpack.c.bf16 %v605_v53, %v604_v52  ;;  %v647_v52 = vld [vmem:[#allocation9 + $0x1e8] sm:$0xff] }
  0xe1   :  { %v253_v8 = vrot.slane %v148_v0, %v252_v63  ;;  %v1232_v63 = vpack.c.bf16 %v637_v56, %v636_v55  ;;  %v620_v0 = vld [vmem:[#allocation9 + $0x110] sm:$0xff]  ;;  %v598_v56 = vld [vmem:[#allocation9 + $0x60] sm:$0xff] }
  0xe2   :  { %v278_v19 = vsel %vm254_vm0, %v277_v5, %v273_v10  ;;  %v639_v5 = vld [vmem:[#allocation9 + $0x1a8] sm:$0xff] }
  0xe3   :  { %v158_v4 = vpop.xlane.xlu1 %157  ;;  %v255_v25 = vsel %vm254_vm0, %v253_v8, %v248_v14  ;;  %v591_v8 = vld [vmem:[#allocation9 + $0x28] sm:$0xff]  ;;  %v609_v14 = vld [vmem:[#allocation9 + $0xb8] sm:$0xff] }
  0xe4   :  { %v150_v6 = vpop.xlane.xlu0 %149  ;;  %v282_v9 = vrot.slane %v158_v4, %v259_v2  ;;  %v638_v4 = vld [vmem:[#allocation9 + $0x1a0] sm:$0xff] }
  0xe5   :  { %v260_v11 = vrot.slane %v150_v6, %v259_v2  ;;  %v606_v2 = vld [vmem:[#allocation9 + $0xa0] sm:$0xff]  ;;  %v1234_v6 = vpack.c.bf16 %v621_v1, %v620_v0  ;;  %v1236_v10 = vpack.c.bf16 %v639_v5, %v638_v4  ;;  %v616_v1 = vld [vmem:[#allocation9 + $0xf0] sm:$0xff]  ;;  %v649_v5 = vld [vmem:[#allocation9 + $0x1f8] sm:$0xff] }
  0xe6   :  { %v283_v26 = vsel %vm261_vm1, %v282_v9, %v278_v19  ;;  %v1204_v9 = vpack.c.bf16 %v607_v3, %v606_v2  ;;  %v592_v19 = vld [vmem:[#allocation9 + $0x30] sm:$0xff]  ;;  %v617_v2 = vld [vmem:[#allocation9 + $0xf8] sm:$0xff] }
  0xe7   :  { %v160_v15 = vpop.xlane.xlu1 %159  ;;  %v262_v29 = vsel %vm261_vm1, %v260_v11, %v255_v25  ;;  %v622_v11 = vld [vmem:[#allocation9 + $0x120] sm:$0xff]  ;;  %v648_v3 = vld [vmem:[#allocation9 + $0x1f0] sm:$0xff]  ;;  %v1224_v4 = vpack.c.bf16 %v617_v2, %v616_v1 }
  0xe8   :  { %v287_v20 = vrot.slane %v160_v15, %v266_v7  ;;  %v152_v21 = vpop.xlane.xlu0 %151  ;;  %v640_v15 = vld [vmem:[#allocation9 + $0x1b0] sm:$0xff]  ;;  %v1238_v18 = vpack.c.bf16 %v623_v12, %v622_v11  ;;  %v610_v25 = vld [vmem:[#allocation9 + $0xc0] sm:$0xff] }
  0xe9   :  { %v267_v27 = vrot.slane %v152_v21, %v266_v7  ;;  %v590_v7 = vld [vmem:[#allocation9 + $0x20] sm:$0xff]  ;;  %v1208_v21 = vpack.c.bf16 %v609_v14, %v608_v13  ;;  %v1240_v22 = vpack.c.bf16 %v641_v16, %v640_v15  ;;  %v667_v13 = vld [vmem:[#allocation9 + $0x288] sm:$0xff] }
  0xea   :  { %v288_v30 = vsel %vm268_vm2, %v287_v20, %v283_v26  ;;  %v1206_v17 = vpack.c.bf16 %v591_v8, %v590_v7  ;;  %v593_v20 = vld [vmem:[#allocation9 + $0x38] sm:$0xff]  ;;  %v611_v26 = vld [vmem:[#allocation9 + $0xc8] sm:$0xff]  ;;  %v1256_v7 = vpack.c.bf16 %v649_v5, %v648_v3  ;;  %v666_v12 = vld [vmem:[#allocation9 + $0x280] sm:$0xff] }
  0xeb   :  { %v269_v34 = vsel %vm268_vm2, %v267_v27, %v262_v29  ;;  %v642_v27 = vld [vmem:[#allocation9 + $0x1c0] sm:$0xff]  ;;  %v1210_v29 = vpack.c.bf16 %v593_v20, %v592_v19  ;;  %v1212_v33 = vpack.c.bf16 %v611_v26, %v610_v25  ;;  %v1260_v15 = vpack.c.bf16 %v667_v13, %v666_v12  ;;  %v699_v16 = vld [vmem:[#allocation9 + $0x388] sm:$0xff]  ;;  %v1574_v20 = vld [vmem:[#allocation8] sm:$0xff] }
  0xec   :  { %v290_v40 = vsel %vm289_vm3, %v288_v30, %v269_v34  ;;  %v1242_v30 = vpack.c.bf16 %v625_v24, %v624_v23  ;;  %v698_v14 = vld [vmem:[#allocation9 + $0x380] sm:$0xff]  ;;  %v205_v19 = vsub.s32 2, %v1553_v61  ;;  %v672_v12 = vld [vmem:[#allocation9 + $0x2b0] sm:$0xff] }
  0xed   :  { %1019 = vmatmul.mubr.msk.f32.vlgmr.msra.gmra.mrb[0].mxu0 %vm291_vm4, %v290_v40  ;;  %1020 = vmatmul.mubr.msk.f32.vlgmr.msra.gmra.mrb[0].mxu1 %vm291_vm4, %v290_v40  ;;  %v654_v5 = vld [vmem:[#allocation9 + $0x220] sm:$0xff] }
  0xee   :  { %1183 = vmatpush1.bf16.msra.mxu0 %v1182_v28  ;;  %1191 = vmatpush1.bf16.msra.mxu1 %v1190_v31  ;;  %v643_v28 = vld [vmem:[#allocation9 + $0x1c8] sm:$0xff]  ;;  %v594_v31 = vld [vmem:[#allocation9 + $0x40] sm:$0xff]  ;;  %v206_v24 = vrot.slane %v1574_v20, %v205_v19 }
  0xef   :  { %1185 = vmatprep.subr.bf16.mxu0 %v1184_v35  ;;  %1193 = vmatprep.subr.bf16.mxu1 %v1192_v36  ;;  %v1244_v34 = vpack.c.bf16 %v643_v28, %v642_v27  ;;  %v626_v35 = vld [vmem:[#allocation9 + $0x140] sm:$0xff]  ;;  %v627_v36 = vld [vmem:[#allocation9 + $0x148] sm:$0xff]  ;;  %v1214_v41 = vpack.c.bf16 %v595_v32, %v594_v31 }
  0xf0   :  { %500 = vmatprep.mubr.f32.mxu0 %v1464_v54  ;;  %571 = vmatprep.mubr.f32.mxu1 %v1464_v54  ;;  %v1202_v54 = vpack.c.bf16 %v589_v60, %v588_v59  ;;  %v1246_v42 = vpack.c.bf16 %v627_v36, %v626_v35  ;;  %v599_v59 = vld [vmem:[#allocation9 + $0x68] sm:$0xff]  ;;  %v630_v60 = vld [vmem:[#allocation9 + $0x160] sm:$0xff] }
  0xf1   :  { %v682_v35 = vld [vmem:[#allocation9 + $0x300] sm:$0xff]  ;;  %v683_v36 = vld [vmem:[#allocation9 + $0x308] sm:$0xff] }
  0xf2   :  { %1187 = vmatpush1.bf16.msra.mxu0 %v1186_v44  ;;  %1195 = vmatpush1.bf16.msra.mxu1 %v1194_v45  ;;  %v597_v44 = vld [vmem:[#allocation9 + $0x58] sm:$0xff]  ;;  %v1216_v45 = vpack.c.bf16 %v613_v38, %v612_v37  ;;  %v668_v37 = vld [vmem:[#allocation9 + $0x290] sm:$0xff] }
  0xf3   :  { %1197 = vmatprep.subr.bf16.mxu0 %v1196_v48  ;;  %1229 = vmatprep.subr.bf16.mxu1 %v1228_v49  ;;  %v629_v48 = vld [vmem:[#allocation9 + $0x158] sm:$0xff]  ;;  %v614_v49 = vld [vmem:[#allocation9 + $0xe0] sm:$0xff]  ;;  %v1218_v53 = vpack.c.bf16 %v597_v44, %v596_v43  ;;  %v700_v43 = vld [vmem:[#allocation9 + $0x390] sm:$0xff] }
  0xf4   :  { %v1250_v55 = vpack.c.bf16 %v629_v48, %v628_v47  ;;  %v701_v44 = vld [vmem:[#allocation9 + $0x398] sm:$0xff]  ;;  %v1294_v48 = vpack.c.bf16 %v683_v36, %v682_v35  ;;  %v658_v35 = vld [vmem:[#allocation9 + $0x240] sm:$0xff]  ;;  %v659_v36 = vld [vmem:[#allocation9 + $0x248] sm:$0xff] }
  0xf5   :  { %1021 = vmatmul.mubr.msk.f32.vlgmr.msra.gmra.mrb[2].mxu0 %vm291_vm4, %v290_v40  ;;  %1022 = vmatmul.mubr.msk.f32.vlgmr.msra.gmra.mrb[2].mxu1 %vm291_vm4, %v290_v40  ;;  %v645_v40 = vld [vmem:[#allocation9 + $0x1d8] sm:$0xff] }
  0xf6   :  { %1199 = vmatpush3.bf16.msra.mxu0 %v1198_v57  ;;  %1231 = vmatpush3.bf16.msra.mxu1 %v1230_v58  ;;  %v1248_v46 = vpack.c.bf16 %v645_v40, %v644_v39  ;;  %v1220_v57 = vpack.c.bf16 %v615_v50, %v614_v49  ;;  %v1252_v58 = vpack.c.bf16 %v647_v52, %v646_v51  ;;  %v217_v40 = vsub.s32 5, %v1553_v61  ;;  %v652_v49 = vld [vmem:[#allocation9 + $0x210] sm:$0xff]  ;;  %v653_v50 = vld [vmem:[#allocation9 + $0x218] sm:$0xff] }
  0xf7   :  { %1201 = vmatprep.subr.bf16.mxu0 %v1200_v62  ;;  %1233 = vmatprep.subr.bf16.mxu1 %v1232_v63  ;;  %v631_v62 = vld [vmem:[#allocation9 + $0x168] sm:$0xff]  ;;  %v1222_v63 = vpack.c.bf16 %v599_v59, %v598_v56  ;;  %v684_v56 = vld [vmem:[#allocation9 + $0x310] sm:$0xff]  ;;  %v1266_v3 = vpack.c.bf16 %v653_v50, %v652_v49 }
  0xf8   :  { %v1254_v0 = vpack.c.bf16 %v631_v62, %v630_v60  ;;  %v218_v59 = vrot.slane %v1574_v20, %v217_v40  ;;  %v671_v62 = vld [vmem:[#allocation9 + $0x2a8] sm:$0xff] }
  0xf9   :  { %v691_v40 = vld [vmem:[#allocation9 + $0x348] sm:$0xff] }
  0xfa   :  { %1203 = vmatpush3.bf16.msra.mxu0 %v1202_v54  ;;  %1235 = vmatpush3.bf16.msra.mxu1 %v1234_v6  ;;  %v600_v54 = vld [vmem:[#allocation9 + $0x70] sm:$0xff]  ;;  %v601_v6 = vld [vmem:[#allocation9 + $0x78] sm:$0xff] }
  0xfb   :  { %1205 = vmatprep.subr.bf16.mxu0 %v1204_v9  ;;  %1237 = vmatprep.subr.bf16.mxu1 %v1236_v10  ;;  %v1226_v8 = vpack.c.bf16 %v601_v6, %v600_v54  ;;  %v632_v9 = vld [vmem:[#allocation9 + $0x170] sm:$0xff]  ;;  %v633_v10 = vld [vmem:[#allocation9 + $0x178] sm:$0xff]  ;;  %v655_v54 = vld [vmem:[#allocation9 + $0x228] sm:$0xff] }
  0xfc   :  { %v1258_v11 = vpack.c.bf16 %v633_v10, %v632_v9  ;;  %v686_v10 = vld [vmem:[#allocation9 + $0x320] sm:$0xff] }
  0xfe   :  { %1207 = vmatpush3.bf16.msra.mxu0 %v1206_v17  ;;  %1239 = vmatpush3.bf16.msra.mxu1 %v1238_v18  ;;  %v1292_v17 = vpack.c.bf16 %v699_v16, %v698_v14  ;;  %v197_v18 = vsub.s32 0, %v1553_v61  ;;  %v704_v16 = vld [vmem:[#allocation9 + $0x3b0] sm:$0xff] }
  0xff   :  { %1209 = vmatprep.subr.bf16.mxu0 %v1208_v21  ;;  %1241 = vmatprep.subr.bf16.mxu1 %v1240_v22  ;;  %v201_v21 = vsub.s32 1, %v1553_v61  ;;  %v209_v22 = vsub.s32 3, %v1553_v61 }
 0x100   :  { %v198_v23 = vrot.slane %v1574_v20, %v197_v18 }
 0x101   :  { %v202_v25 = vrot.slane %v1574_v20, %v201_v21  ;;  %v210_v26 = vrot.slane %v1574_v20, %v209_v22  ;;  %v1270_v21 = vpack.c.bf16 %v655_v54, %v654_v5  ;;  %v694_v5 = vld [vmem:[#allocation9 + $0x360] sm:$0xff]  ;;  %v695_v54 = vld [vmem:[#allocation9 + $0x368] sm:$0xff] }
 0x102   :  { %1211 = vmatpush3.bf16.msra.mxu0 %v1210_v29  ;;  %1243 = vmatpush3.bf16.msra.mxu1 %v1242_v30  ;;  %v650_v29 = vld [vmem:[#allocation9 + $0x200] sm:$0xff]  ;;  %v651_v30 = vld [vmem:[#allocation9 + $0x208] sm:$0xff] }
 0x103   :  { %1213 = vmatprep.subr.bf16.mxu0 %v1212_v33  ;;  %1245 = vmatprep.subr.bf16.mxu1 %v1244_v34  ;;  %v1262_v47 = vpack.c.bf16 %v651_v30, %v650_v29  ;;  %v674_v29 = vld [vmem:[#allocation9 + $0x2c0] sm:$0xff]  ;;  %v675_v30 = vld [vmem:[#allocation9 + $0x2c8] sm:$0xff] }
 0x106   :  { %1215 = vmatpush3.bf16.msra.mxu0 %v1214_v41  ;;  %1247 = vmatpush3.bf16.msra.mxu1 %v1246_v42  ;;  %v225_v41 = vsub.s32 7, %v1553_v61  ;;  %v669_v42 = vld [vmem:[#allocation9 + $0x298] sm:$0xff] }
 0x107   :  { %1217 = vmatprep.subr.bf16.mxu0 %v1216_v45  ;;  %1249 = vmatprep.subr.bf16.mxu1 %v1248_v46 }
 0x108   :  { %v226_v60 = vrot.slane %v1574_v20, %v225_v41  ;;  %v676_v41 = vld [vmem:[#allocation9 + $0x2d0] sm:$0xff] }
 0x10a   :  { %1219 = vmatpush3.bf16.msra.mxu0 %v1218_v53  ;;  %1251 = vmatpush3.bf16.msra.mxu1 %v1250_v55  ;;  %v1264_v53 = vpack.c.bf16 %v669_v42, %v668_v37  ;;  %v1296_v55 = vpack.c.bf16 %v701_v44, %v700_v43  ;;  %v1276_v37 = vpack.c.bf16 %v675_v30, %v674_v29  ;;  %v677_v42 = vld [vmem:[#allocation9 + $0x2d8] sm:$0xff]  ;;  %v708_v43 = vld [vmem:[#allocation9 + $0x3d0] sm:$0xff] }
 0x10b   :  { %1221 = vmatprep.subr.bf16.mxu0 %v1220_v57  ;;  %1253 = vmatprep.subr.bf16.mxu1 %v1252_v58  ;;  %v685_v57 = vld [vmem:[#allocation9 + $0x318] sm:$0xff]  ;;  %v670_v58 = vld [vmem:[#allocation9 + $0x2a0] sm:$0xff]  ;;  %v1280_v49 = vpack.c.bf16 %v677_v42, %v676_v41 }
 0x10c   :  { %v709_v44 = vld [vmem:[#allocation9 + $0x3d8] sm:$0xff] }
 0x10d   :  { %v1312_v50 = vpack.c.bf16 %v709_v44, %v708_v43 }
 0x10e   :  { %1223 = vmatpush3.bf16.msra.mxu0 %v1222_v63  ;;  %1255 = vmatpush3.bf16.msra.mxu1 %v1254_v0  ;;  %v702_v63 = vld [vmem:[#allocation9 + $0x3a0] sm:$0xff]  ;;  %v703_v0 = vld [vmem:[#allocation9 + $0x3a8] sm:$0xff] }
 0x10f   :  { %1225 = vmatprep.subr.bf16.mxu0 %v1224_v4  ;;  %1257 = vmatprep.subr.bf16.mxu1 %v1256_v7  ;;  %v1298_v4 = vpack.c.bf16 %v685_v57, %v684_v56  ;;  %v1300_v9 = vpack.c.bf16 %v703_v0, %v702_v63  ;;  %v710_v56 = vld [vmem:[#allocation9 + $0x3e0] sm:$0xff]  ;;  %v711_v57 = vld [vmem:[#allocation9 + $0x3e8] sm:$0xff]  ;;  %v221_v0 = vsub.s32 6, %v1553_v61 }
 0x110   :  { %v663_v63 = vld [vmem:[#allocation9 + $0x268] sm:$0xff] }
 0x112   :  { %1227 = vmatpush3.bf16.msra.mxu0 %v1226_v8  ;;  %1259 = vmatpush3.bf16.msra.mxu1 %v1258_v11  ;;  %v1268_v8 = vpack.c.bf16 %v671_v62, %v670_v58  ;;  %v687_v11 = vld [vmem:[#allocation9 + $0x328] sm:$0xff]  ;;  %v213_v58 = vsub.s32 4, %v1553_v61  ;;  %v662_v62 = vld [vmem:[#allocation9 + $0x260] sm:$0xff] }
 0x113   :  { %1261 = vmatprep.subr.bf16.mxu0 %v1260_v15  ;;  %1293 = vmatprep.subr.bf16.mxu1 %v1292_v17  ;;  %v673_v15 = vld [vmem:[#allocation9 + $0x2b8] sm:$0xff]  ;;  %v1302_v22 = vpack.c.bf16 %v687_v11, %v686_v10  ;;  %v1286_v11 = vpack.c.bf16 %v663_v63, %v662_v62 }
 0x114   :  { %v705_v17 = vld [vmem:[#allocation9 + $0x3b8] sm:$0xff]  ;;  %v214_v10 = vrot.slane %v1574_v20, %v213_v58 }
 0x1c0   :  { %v360_v27 = vpop.f32.mrb[0].mxu0  ;;  %v431_v28 = vpop.f32.mrb[0].mxu1 }
 0x1c1   :  { %v361_v31 = vadd.f32 %v360_v27, %v198_v23  ;;  %v432_v32 = vadd.f32 %v431_v28, %v206_v24  ;;  %v362_v33 = vpop.f32.mrb[1].mxu0  ;;  %v433_v34 = vpop.f32.mrb[1].mxu1  ;;  %v656_v23 = vld [vmem:[#allocation9 + $0x230] sm:$0xff]  ;;  %v657_v24 = vld [vmem:[#allocation9 + $0x238] sm:$0xff] }
 0x1c2   :  { %v363_v38 = vadd.f32 %v362_v33, %v202_v25  ;;  %v434_v39 = vadd.f32 %v433_v34, %v210_v26  ;;  %v1272_v25 = vpack.c.bf16 %v673_v15, %v672_v12  ;;  %v1304_v26 = vpack.c.bf16 %v705_v17, %v704_v16  ;;  %v688_v27 = vld [vmem:[#allocation9 + $0x330] sm:$0xff]  ;;  %v689_v28 = vld [vmem:[#allocation9 + $0x338] sm:$0xff] }
 0x1c3   :  { %v578_v51 = vmax.f32 %v361_v31, 0.0  ;;  %v580_v52 = vmax.f32 %v432_v32, 0.0  ;;  %v706_v31 = vld [vmem:[#allocation9 + $0x3c0] sm:$0xff]  ;;  %v707_v32 = vld [vmem:[#allocation9 + $0x3c8] sm:$0xff]  ;;  %v1274_v33 = vpack.c.bf16 %v657_v24, %v656_v23  ;;  %v1306_v34 = vpack.c.bf16 %v689_v28, %v688_v27  ;;  %v665_v16 = vld [vmem:[#allocation9 + $0x278] sm:$0xff] }
 0x1c4   :  { %v579_v45 = vmax.f32 %v363_v38, 0.0  ;;  %v581_v46 = vmax.f32 %v434_v39, 0.0  ;;  %v1308_v38 = vpack.c.bf16 %v707_v32, %v706_v31  ;;  %v690_v39 = vld [vmem:[#allocation9 + $0x340] sm:$0xff]  ;;  %v1318_v12 = vpack.c.bf16 %v695_v54, %v694_v5  ;;  %v696_v17 = vld [vmem:[#allocation9 + $0x370] sm:$0xff]  ;;  %v1023_v27 = vld [vmem:[%s1615_s4] ss:$0 sm:$0xff] }
 0x1c6   :  { %785 = vmatprep.mubr.f32.mxu0 %v579_v45  ;;  %855 = vmatprep.mubr.f32.mxu1 %v581_v46  ;;  %v1278_v45 = vpack.c.bf16 %v659_v36, %v658_v35  ;;  %v1310_v46 = vpack.c.bf16 %v691_v40, %v690_v39 }
 0x1c7   :  { %786 = vmatmul.mubr.f32.vlgmr.msra.gmra.mrb[4].mxu0 %v578_v51  ;;  %856 = vmatmul.mubr.f32.vlgmr.msra.gmra.mrb[4].mxu1 %v580_v52  ;;  %v692_v51 = vld [vmem:[#allocation9 + $0x350] sm:$0xff]  ;;  %v693_v52 = vld [vmem:[#allocation9 + $0x358] sm:$0xff] }
 0x1c8   :  { %v1586_v1 = vpop.f32.mrb[2].mxu0  ;;  %v1588_v2 = vpop.f32.mrb[2].mxu1  ;;  %1263 = vmatpush3.bf16.msra.mxu0 %v1262_v47  ;;  %1295 = vmatpush3.bf16.msra.mxu1 %v1294_v48  ;;  %v660_v47 = vld [vmem:[#allocation9 + $0x250] sm:$0xff]  ;;  %v661_v48 = vld [vmem:[#allocation9 + $0x258] sm:$0xff] }
 0x1c9   :  { %v504_v6 = vpop.f32.mrb[3].mxu0  ;;  %v575_v7 = vpop.f32.mrb[3].mxu1  ;;  %1265 = vmatprep.subr.bf16.mxu0 %v1264_v53  ;;  %1297 = vmatprep.subr.bf16.mxu1 %v1296_v55  ;;  %v678_v53 = vld [vmem:[#allocation9 + $0x2e0] sm:$0xff]  ;;  %v679_v55 = vld [vmem:[#allocation9 + $0x2e8] sm:$0xff] }
 0x1ca   :  { %v505_v13 = vadd.f32 %v504_v6, %v218_v59  ;;  %v576_v14 = vadd.f32 %v575_v7, %v226_v60  ;;  %v1282_v59 = vpack.c.bf16 %v661_v48, %v660_v47  ;;  %v1314_v60 = vpack.c.bf16 %v693_v52, %v692_v51  ;;  %v680_v6 = vld [vmem:[#allocation9 + $0x2f0] sm:$0xff]  ;;  %v681_v7 = vld [vmem:[#allocation9 + $0x2f8] sm:$0xff] }
 0x1cb   :  { %v1288_v61 = vpack.c.bf16 %v681_v7, %v680_v6 }
 0x1cc   :  { %v583_v18 = vmax.f32 %v505_v13, 0.0  ;;  %v585_v19 = vmax.f32 %v576_v14, 0.0  ;;  %1267 = vmatpush3.bf16.msra.mxu0 %v1266_v3  ;;  %1299 = vmatpush3.bf16.msra.mxu1 %v1298_v4  ;;  %v1284_v3 = vpack.c.bf16 %v679_v55, %v678_v53  ;;  %v1316_v4 = vpack.c.bf16 %v711_v57, %v710_v56  ;;  %v664_v13 = vld [vmem:[#allocation9 + $0x270] sm:$0xff] }
 0x1cd   :  { %1269 = vmatprep.subr.bf16.mxu0 %v1268_v8  ;;  %1301 = vmatprep.subr.bf16.mxu1 %v1300_v9  ;;  %v712_v8 = vld [vmem:[#allocation9 + $0x3f0] sm:$0xff]  ;;  %v713_v9 = vld [vmem:[#allocation9 + $0x3f8] sm:$0xff]  ;;  %v222_v14 = vrot.slane %v1574_v20, %v221_v0 }
 0x1ce   :  { %925 = vmatprep.mubr.f32.mxu0 %v583_v18  ;;  %995 = vmatprep.mubr.f32.mxu1 %v585_v19  ;;  %v1320_v15 = vpack.c.bf16 %v713_v9, %v712_v8  ;;  %v697_v18 = vld [vmem:[#allocation9 + $0x378] sm:$0xff]  ;;  %v1290_v19 = vpack.c.bf16 %v665_v16, %v664_v13 }
 0x1cf   :  { %v574_v23 = vadd.f32 %v1588_v2, %v222_v14 }
 0x1d0   :  { %1271 = vmatpush3.bf16.msra.mxu0 %v1270_v21  ;;  %1303 = vmatpush3.bf16.msra.mxu1 %v1302_v22  ;;  %v1322_v21 = vpack.c.bf16 %v697_v18, %v696_v17  ;;  %v503_v22 = vadd.f32 %v1586_v1, %v214_v10 }
 0x1d1   :  { %1273 = vmatprep.subr.bf16.mxu0 %v1272_v25  ;;  %1305 = vmatprep.subr.bf16.mxu1 %v1304_v26  ;;  %v584_v24 = vmax.f32 %v574_v23, 0.0 }
 0x1d2   :  { %v582_v20 = vmax.f32 %v503_v22, 0.0 }
 0x1d4   :  { %1275 = vmatpush3.bf16.msra.mxu0 %v1274_v33  ;;  %1307 = vmatpush3.bf16.msra.mxu1 %v1306_v34 }
 0x1d5   :  { %1277 = vmatprep.subr.bf16.mxu0 %v1276_v37  ;;  %1309 = vmatprep.subr.bf16.mxu1 %v1308_v38 }
 0x1d8   :  { %1279 = vmatpush3.bf16.msra.mxu0 %v1278_v45  ;;  %1311 = vmatpush3.bf16.msra.mxu1 %v1310_v46 }
 0x1d9   :  { %1281 = vmatprep.subr.bf16.mxu0 %v1280_v49  ;;  %1313 = vmatprep.subr.bf16.mxu1 %v1312_v50 }
 0x1dc   :  { %1283 = vmatpush3.bf16.msra.mxu0 %v1282_v59  ;;  %1315 = vmatpush3.bf16.msra.mxu1 %v1314_v60 }
 0x1dd   :  { %1285 = vmatprep.subr.bf16.mxu0 %v1284_v3  ;;  %1317 = vmatprep.subr.bf16.mxu1 %v1316_v4 }
 0x1e0   :  { %1287 = vmatpush3.bf16.msra.mxu0 %v1286_v11  ;;  %1319 = vmatpush3.bf16.msra.mxu1 %v1318_v12 }
 0x1e1   :  { %1289 = vmatprep.subr.bf16.mxu0 %v1288_v61  ;;  %1321 = vmatprep.subr.bf16.mxu1 %v1320_v15 }
 0x1e4   :  { %1291 = vmatpush3.bf16.msra.mxu0 %v1290_v19  ;;  %1323 = vmatpush3.bf16.msra.mxu1 %v1322_v21 }
 0x1e7   :  { %926 = vmatmul.mubr.f32.vlgmr.msra.gmra.mrb[6].mxu0 %v582_v20  ;;  %996 = vmatmul.mubr.f32.vlgmr.msra.gmra.mrb[6].mxu1 %v584_v24 }
 0x29a   :  { %v1056_v25 = vpop.f32.mrb[4].mxu0  ;;  %v1091_v26 = vpop.f32.mrb[4].mxu1 }
 0x29b   :  { %v1057_v28 = vpop.f32.mrb[5].mxu0  ;;  %v1092_v29 = vpop.f32.mrb[5].mxu1 }
 0x29c   :  { %v1058_v30 = vadd.f32 %v1057_v28, %v1056_v25  ;;  %v1093_v1 = vadd.f32 %v1092_v29, %v1091_v26 }
 0x29e   :  { %v788_v31 = vadd.f32 %v1058_v30, %v1023_v27 }
 0x2a0   :  { %v858_v2 = vadd.f32 %v1093_v1, %v788_v31 }
 0x2ba   :  { %v1126_v32 = vpop.f32.mrb[6].mxu0  ;;  %v1161_v33 = vpop.f32.mrb[6].mxu1 }
 0x2bb   :  { %v1127_v34 = vpop.f32.mrb[7].mxu0  ;;  %v1162_v35 = vpop.f32.mrb[7].mxu1 }
 0x2bc   :  { %v1128_v36 = vadd.f32 %v1127_v34, %v1126_v32  ;;  %v1163_v37 = vadd.f32 %v1162_v35, %v1161_v33 }
 0x2be   :  { %v928_v38 = vadd.f32 %v1128_v36, %v858_v2 }
 0x2c0   :  { %v998_v39 = vadd.f32 %v1163_v37, %v928_v38 }
 0x2c2   :  { %1001 = vst [vmem:[#allocation11] sm:$0x3] %v998_v39 }
 0x2c3   :  { %1435 = shalt.err (!%p1432_p8)
}
 0x2c4   :  { %s1436_s23 = scalar_lea.hbm %s1616_s5, 32 }
 0x2c5   :  { %p1437_p9 = scmp.ne.s32.totalorder %s1616_s5, %s1436_s23  ;;  %p1440_p10 = scmp.lt.u32.totalorder %s1436_s23, %s1616_s5 }
 0x2c7   :  { %p1442_p11 = pnand %p1440_p10, %p1437_p9 }
 0x2c9   :  { %1445 = shalt.err (!%p1442_p11)
}
 0x2ca   :  { %1011 = dma.vmem_to_hbm [thread:$0]  %s1009_s20, 32, %s1616_s5, [#allocation5]  }
 0x2cb   :  { %1452 = dma.done.wait [#allocation5], 32  }
 0x2cc   :  { %1453 = vsyncadd [#allocation5], 4294967264 }
 0x2cd   :  { %1015 = vsyncpa [#allocation4], 1 }
 0x2ce   :  { %1016 = vsyncpa [#allocation7], 1 }
 0x2cf   :  { %1017 = vsyncpa [#allocation10], 1 }
 0x2d0   :  { %1018 = vsyncpa [#allocation5], 1 }

</bundles_post_ra>
